<compile_context>
chip_gen: v7x
topology: tpu7x:2x2x1
jax: 0.10.0
libtpu: 0.0.40
codegen_flags: <defaults>
</compile_context>

<pallas_src>
import functools

import jax
import jax.numpy as jnp
from jax.experimental import pallas as pl
from jax.experimental.pallas import tpu as pltpu


def readout_kernel(x_ref, p_ref, o_ref, seg_ref, cnt_ref, *,
                   num_position, num_streams, l_total, mask_tail):
    """One (sample-block, L-chunk) grid step.

    x_ref:   (nb, M, C, Lt)  raw per-stream features (native dtype)
    p_ref:   (P, C)          L2-normalized prototypes (resident block)
    o_ref:   (nb, C)         per-sample readout (written on the last L chunk)
    seg_ref: (nb, P, C) f32  running per-(sample, prototype) feature sums
    cnt_ref: (nb, P, 1) f32  running per-(sample, prototype) node counts
    """
    P = num_position
    M = num_streams
    nb, _, C, lt = x_ref.shape

    li = pl.program_id(1)

    @pl.when(li == 0)
    def _():
        seg_ref[...] = jnp.zeros_like(seg_ref)
        cnt_ref[...] = jnp.zeros_like(cnt_ref)

    # M-stream sum, slice-by-slice in f32 (v5e has no bf16 VALU; f32 keeps
    # bf16-input accumulation accurate).  The 1/M mean scale is folded into
    # the finalize weight below (argmax is invariant to it).
    xm = x_ref[:, 0, :, :].astype(jnp.float32)                # (nb, C, Lt)
    for m in range(1, M):
        xm = xm + x_ref[:, m, :, :].astype(jnp.float32)

    if mask_tail:  # zero lanes past the end of the node axis (partial chunk)
        lane = jax.lax.broadcasted_iota(jnp.int32, (1, 1, lt), 2)
        valid = (li * lt + lane) < l_total
        xm = jnp.where(valid, xm, 0.0)

    # Similarity scores (prototypes pre-normalized => argmax == argmin of
    # cosine distance).  One batched MXU matmul, C contracted.
    pb = jnp.broadcast_to(p_ref[...][None], (nb, P, C))
    s = jax.lax.dot_general(pb, xm, (((2,), (1,)), ((0,), (0,))),
                            preferred_element_type=jnp.float32)  # (nb, P, Lt)

    # Hard alignment: first-occurrence argmax over P -> one-hot A.
    smax = jnp.max(s, axis=1, keepdims=True)                  # (nb, 1, Lt)
    iota = jax.lax.broadcasted_iota(jnp.int32, s.shape, 1)
    idx = jnp.min(jnp.where(s >= smax, iota, P), axis=1, keepdims=True)
    A = (iota == idx).astype(jnp.float32)                     # (nb, P, Lt)
    if mask_tail:
        A = jnp.where(valid, A, 0.0)

    # Accumulate per-(sample, prototype) node counts and feature sums.
    cnt_ref[...] += jnp.sum(A, axis=2, keepdims=True)         # (nb, P, 1)
    seg_ref[...] += jax.lax.dot_general(
        A, xm, (((2,), (2,)), ((0,), (0,))),
        preferred_element_type=jnp.float32)                   # (nb, P, C)

    @pl.when(li == pl.num_programs(1) - 1)
    def _():
        # segment mean (empty segment -> 0), mean over P, undo the missing 1/M.
        inv = 1.0 / (float(M * P) * jnp.maximum(cnt_ref[...], 1.0))  # (nb,P,1)
        o_ref[...] = jnp.sum(seg_ref[...] * inv, axis=1).astype(o_ref.dtype)


def _readout_call(x4, p_norm, *, n_rows, nb, l_tile_target, out_dtype):
    """One pallas_call over the first `n_rows` samples of x4 in nb-blocks."""
    _, M, C, L = x4.shape
    P = p_norm.shape[0]
    assert n_rows % nb == 0
    n_blocks = n_rows // nb
    itemsize = jnp.dtype(x4.dtype).itemsize

    # Node-axis chunking: lane-aligned (multiple-of-128) chunks of at most
    # l_tile_target lanes; take the whole axis in one block when it is small.
    if L >= 256 and L > l_tile_target:
        l_tile = max(128, (min(l_tile_target, L) // 128) * 128)
    else:
        l_tile = L
    n_l = pl.cdiv(L, l_tile)
    mask_tail = (L % l_tile) != 0

    kernel = functools.partial(readout_kernel, num_position=P, num_streams=M,
                               l_total=L, mask_tail=mask_tail)

    # Scoped-VMEM budget: double-buffered x chunk + f32 temporaries + scratch.
    x_block = nb * M * C * l_tile * itemsize
    est = (2 * x_block
           + 6 * nb * C * l_tile * 4           # xm / per-m casts / mask temp
           + 4 * nb * P * l_tile * 4           # scores, iota, one-hot
           + 2 * nb * P * (C + 1) * 4          # seg_sum / count scratch
           + P * C * 4 + 2 * nb * C * 4)
    vmem_limit = int(min(max(est, 32 * 1024 * 1024), 64 * 1024 * 1024))

    # HBM-bandwidth-bound custom call: tell XLA how heavy it is.
    cost = pl.CostEstimate(
        flops=int(4 * n_rows * P * C * L + n_rows * (M - 1) * C * L),
        transcendentals=0,
        bytes_accessed=int(n_rows * M * C * L * itemsize
                           + P * C * 4 + n_rows * C * 4))

    return pl.pallas_call(
        kernel,
        out_shape=jax.ShapeDtypeStruct((n_rows, C), out_dtype),
        grid_spec=pltpu.PrefetchScalarGridSpec(
            num_scalar_prefetch=0,
            grid=(n_blocks, n_l),
            in_specs=[
                pl.BlockSpec((nb, M, C, l_tile), lambda n, l: (n, 0, 0, l)),
                pl.BlockSpec((P, C), lambda n, l: (0, 0)),
            ],
            out_specs=pl.BlockSpec((nb, C), lambda n, l: (n, 0)),
            scratch_shapes=[
                pltpu.VMEM((nb, P, C), jnp.float32),
                pltpu.VMEM((nb, P, 1), jnp.float32),
            ],
        ),
        compiler_params=pltpu.CompilerParams(
            dimension_semantics=("parallel", "arbitrary"),
            vmem_limit_bytes=vmem_limit),
        cost_estimate=cost,
    )(x4, p_norm)


def readout_neck(x, protos, *, samples_per_step=8, l_tile_target=512,
                 eps=1e-8, out_dtype=jnp.float32):
    """x: (N, M, C, T, V); protos: (P, C) -> (N, C) readout features."""
    N, M, C, T, V = x.shape
    P, Cp = protos.shape
    assert Cp == C
    L = T * V

    # Free contiguous reshape only -- x stays in its native dtype on the wire
    # (bf16 inputs are DMA'd as bf16 and upcast inside the kernel).
    x4 = x.reshape(N, M, C, L)

    # Prototype-only math done once here; the kernel then takes a raw-score
    # argmax (== cosine-distance argmin, incl. the zero-norm tie to proto 0).
    p = protos.astype(jnp.float32)
    pn = jnp.sqrt(jnp.sum(p * p, axis=1, keepdims=True))
    p_norm = p / jnp.maximum(pn, eps)

    # Sample-axis blocking: nb is a multiple of 8 (sublane-aligned output
    # block).  The main call reads the first floor(N/nb)*nb samples directly
    # out of the full activation (no pad, no copy); a ragged tail gets its
    # own tiny pallas_call on just the tail slice.
    # TODO(synk): for N < 8 there is a single "parallel" grid step, so one of
    # v7x's two TensorCores idles for very small batches.
    nb = N if N < 8 else max(8, (min(samples_per_step, N) // 8) * 8)
    n_main = (N // nb) * nb

    call = functools.partial(_readout_call, p_norm=p_norm,
                             l_tile_target=l_tile_target, out_dtype=out_dtype)
    if n_main == N:
        return call(x4, n_rows=N, nb=nb)
    out_main = call(x4, n_rows=n_main, nb=nb)
    out_tail = call(x4[n_main:], n_rows=N - n_main, nb=N - n_main)
    return jnp.concatenate([out_main, out_tail], axis=0)


def readout_neck_reference(x, protos, eps=1e-8):
    """Pure-JAX reference mirroring the PyTorch forward (read_op='mean')."""
    N, M, C, T, V = x.shape
    P = protos.shape[0]
    nodes = jnp.transpose(jnp.mean(x, axis=1), (0, 2, 3, 1)).reshape(N, T * V, C)
    xn = jnp.linalg.norm(nodes, axis=-1)                           # (N, L)
    pn = jnp.linalg.norm(protos, axis=-1)                          # (P,)
    cos = jnp.einsum('nlc,pc->nlp', nodes, protos)
    cos = cos / jnp.maximum(xn[..., None] * pn[None, None, :], eps)
    D = 1.0 - cos
    idx = jnp.argmin(D, axis=-1)                                   # (N, L)
    A = jax.nn.one_hot(idx, P, dtype=jnp.float32)                  # (N, L, P)
    counts = jnp.sum(A, axis=1)                                    # (N, P)
    seg_sum = jnp.einsum('nlp,nlc->npc', A, nodes)                 # (N, P, C)
    seg_mean = seg_sum / jnp.maximum(counts, 1.0)[..., None]
    return jnp.mean(seg_mean, axis=1)                              # (N, C)


if __name__ == "__main__":
    def _check(key, N, M, C, T, V, P, **kw):
        kx, kp = jax.random.split(key)
        x = jax.random.normal(kx, (N, M, C, T, V), dtype=jnp.float32)
        # torch.nn.init.xavier_normal_ on (P, C): std = sqrt(2 / (P + C))
        std = (2.0 / (P + C)) ** 0.5
        protos = std * jax.random.normal(kp, (P, C), dtype=jnp.float32)
        out = jax.block_until_ready(readout_neck(x, protos, **kw))
        ref = readout_neck_reference(x, protos)
        assert out.shape == (N, C)
        assert jnp.allclose(out, ref, atol=1e-5, rtol=1e-5), "mismatch vs reference"

    root = jax.random.PRNGKey(0)
    k1, k2 = jax.random.split(root)

    # Case 1: ragged batch (N=12 -> one 8-sample main block + a 4-sample tail
    # call), node axis small enough for a single L chunk.
    _check(k1, N=12, M=2, C=64, T=4, V=8, P=8)

    # Case 2: streamed node axis (L=320, l_tile=128 -> 3 chunks incl. a masked
    # partial tail chunk), single 8-sample "parallel" block.
    _check(k2, N=8, M=2, C=32, T=10, V=32, P=6, l_tile_target=128)

    print("KERNEL_OK")
</pallas_src>

<mosaic_0001>
module attributes {stable_mosaic.version = 11 : i64} {
  func.func @readout_kernel(%arg0: i32, %arg1: i32, %arg2: memref<8x2x64x32xf32, #tpu.memory_space<vmem>>, %arg3: memref<8x64xf32, #tpu.memory_space<vmem>>, %arg4: memref<8x64xf32, #tpu.memory_space<vmem>>, %arg5: memref<8x8x64xf32, #tpu.memory_space<vmem>>, %arg6: memref<8x8x1xf32, #tpu.memory_space<vmem>>) attributes {dimension_semantics = [#tpu.dimension_semantics<parallel>, #tpu.dimension_semantics<arbitrary>], iteration_bounds = array<i64: 1, 1>, scalar_prefetch = 0 : i64, scratch_operands = 2 : i64, tpu.core_type = #tpu.core_type<tc>, window_params = [{transform_indices = @transform_0, window_bounds = array<i64: 8, 2, 64, 32>}, {pipeline_mode = #tpu.pipeline_mode<synchronous>, transform_indices = @transform_1, window_bounds = array<i64: 8, 64>}, {transform_indices = @transform_2, window_bounds = array<i64: 8, 64>}]} {
    %c0_i32 = arith.constant 0 : i32
    %0 = arith.cmpi eq, %arg1, %c0_i32 : i32
    %1 = arith.extui %0 : i1 to i32
    %c0_i32_0 = arith.constant 0 : i32
    %2 = arith.cmpi ne, %1, %c0_i32_0 : i32
    scf.if %2 {
      %cst_27 = arith.constant 0.000000e+00 : f32
      %38 = vector.broadcast %cst_27 : f32 to vector<8x8x64xf32>
      %c0_28 = arith.constant 0 : index
      %c0_29 = arith.constant 0 : index
      %c0_30 = arith.constant 0 : index
      %39 = vector.load %arg5[%c0_28, %c0_29, %c0_30] : memref<8x8x64xf32, #tpu.memory_space<vmem>>, vector<8x8x64xf32>
      tpu.vector_store %arg5[%c0_28, %c0_29, %c0_30], %38 {strides = array<i32>} : memref<8x8x64xf32, #tpu.memory_space<vmem>>, vector<8x8x64xf32>,
      %cst_31 = arith.constant 0.000000e+00 : f32
      %40 = vector.broadcast %cst_31 : f32 to vector<8x8x1xf32>
      %c0_32 = arith.constant 0 : index
      %c0_33 = arith.constant 0 : index
      %c0_34 = arith.constant 0 : index
      %41 = vector.load %arg6[%c0_32, %c0_33, %c0_34] : memref<8x8x1xf32, #tpu.memory_space<vmem>>, vector<8x8x1xf32>
      tpu.vector_store %arg6[%c0_32, %c0_33, %c0_34], %40 {strides = array<i32>} : memref<8x8x1xf32, #tpu.memory_space<vmem>>, vector<8x8x1xf32>,
    } else {
    }
    %c0 = arith.constant 0 : index
    %c0_1 = arith.constant 0 : index
    %c0_2 = arith.constant 0 : index
    %c0_3 = arith.constant 0 : index
    %3 = vector.load %arg2[%c0, %c0_1, %c0_2, %c0_3] : memref<8x2x64x32xf32, #tpu.memory_space<vmem>>, vector<8x1x64x32xf32>
    %4 = vector.shape_cast %3 : vector<8x1x64x32xf32> to vector<8x64x32xf32>
    %c0_4 = arith.constant 0 : index
    %c1 = arith.constant 1 : index
    %c0_5 = arith.constant 0 : index
    %c0_6 = arith.constant 0 : index
    %5 = vector.load %arg2[%c0_4, %c1, %c0_5, %c0_6] : memref<8x2x64x32xf32, #tpu.memory_space<vmem>>, vector<8x1x64x32xf32>
    %6 = vector.shape_cast %5 : vector<8x1x64x32xf32> to vector<8x64x32xf32>
    %7 = arith.addf %4, %6 : vector<8x64x32xf32>
    %c0_7 = arith.constant 0 : index
    %c0_8 = arith.constant 0 : index
    %8 = vector.load %arg3[%c0_7, %c0_8] : memref<8x64xf32, #tpu.memory_space<vmem>>, vector<8x64xf32>
    %9 = vector.shape_cast %8 : vector<8x64xf32> to vector<1x8x64xf32>
    %10 = vector.shape_cast %9 : vector<1x8x64xf32> to vector<1x8x64xf32>
    %11 = vector.broadcast %10 : vector<1x8x64xf32> to vector<8x8x64xf32>
    %cst = arith.constant dense<0.000000e+00> : vector<8x8x32xf32>
    %12 = tpu.matmul %11, %7, %cst {dimension_numbers = #tpu.dot_dimension_numbers<[2], [1], [1], [2], [0, 0, 0, 1, 1, 2], [0], [0]>} : vector<8x8x64xf32>, vector<8x64x32xf32>, vector<8x8x32xf32> -> vector<8x8x32xf32>
    %cst_9 = arith.constant dense<0xFF800000> : vector<8x32xf32>
    %13 = vector.multi_reduction <maximumf>, %12, %cst_9 [1] : vector<8x8x32xf32> to vector<8x32xf32>
    %14 = vector.shape_cast %13 : vector<8x32xf32> to vector<8x1x32xf32>
    %15 = tpu.iota {dimensions = array<i32: 1>} : vector<8x8x32xi32>
    %16 = vector.broadcast %14 : vector<8x1x32xf32> to vector<8x8x32xf32>
    %17 = arith.cmpf oge, %12, %16 : vector<8x8x32xf32>
    %c8_i32 = arith.constant 8 : i32
    %18 = vector.broadcast %c8_i32 : i32 to vector<8x8x32xi32>
    %19 = arith.select %17, %15, %18 : vector<8x8x32xi1>, vector<8x8x32xi32>
    %cst_10 = arith.constant dense<2147483647> : vector<8x32xi32>
    %20 = vector.multi_reduction <minsi>, %19, %cst_10 [1] : vector<8x8x32xi32> to vector<8x32xi32>
    %21 = vector.shape_cast %20 : vector<8x32xi32> to vector<8x1x32xi32>
    %22 = vector.broadcast %21 : vector<8x1x32xi32> to vector<8x8x32xi32>
    %23 = arith.cmpi eq, %15, %22 : vector<8x8x32xi32>
    %24 = arith.extui %23 : vector<8x8x32xi1> to vector<8x8x32xi32>
    %25 = arith.sitofp %24 : vector<8x8x32xi32> to vector<8x8x32xf32>
    %c0_11 = arith.constant 0 : index
    %c0_12 = arith.constant 0 : index
    %c0_13 = arith.constant 0 : index
    %26 = vector.load %arg6[%c0_11, %c0_12, %c0_13] : memref<8x8x1xf32, #tpu.memory_space<vmem>>, vector<8x8x1xf32>
    %cst_14 = arith.constant dense<0.000000e+00> : vector<8x8xf32>
    %27 = vector.multi_reduction <add>, %25, %cst_14 [2] : vector<8x8x32xf32> to vector<8x8xf32>
    %28 = vector.shape_cast %27 : vector<8x8xf32> to vector<8x8x1xf32>
    %29 = arith.addf %26, %28 : vector<8x8x1xf32>
    %c0_15 = arith.constant 0 : index
    %c0_16 = arith.constant 0 : index
    %c0_17 = arith.constant 0 : index
    %30 = vector.load %arg6[%c0_15, %c0_16, %c0_17] : memref<8x8x1xf32, #tpu.memory_space<vmem>>, vector<8x8x1xf32>
    tpu.vector_store %arg6[%c0_15, %c0_16, %c0_17], %29 {strides = array<i32>} : memref<8x8x1xf32, #tpu.memory_space<vmem>>, vector<8x8x1xf32>,
    %c0_18 = arith.constant 0 : index
    %c0_19 = arith.constant 0 : index
    %c0_20 = arith.constant 0 : index
    %31 = vector.load %arg5[%c0_18, %c0_19, %c0_20] : memref<8x8x64xf32, #tpu.memory_space<vmem>>, vector<8x8x64xf32>
    %cst_21 = arith.constant dense<0.000000e+00> : vector<8x8x64xf32>
    %32 = tpu.matmul %25, %7, %cst_21 {dimension_numbers = #tpu.dot_dimension_numbers<[2], [2], [1], [1], [0, 0, 0, 1, 1, 1], [0], [0]>} : vector<8x8x32xf32>, vector<8x64x32xf32>, vector<8x8x64xf32> -> vector<8x8x64xf32>
    %33 = arith.addf %31, %32 : vector<8x8x64xf32>
    %c0_22 = arith.constant 0 : index
    %c0_23 = arith.constant 0 : index
    %c0_24 = arith.constant 0 : index
    %34 = vector.load %arg5[%c0_22, %c0_23, %c0_24] : memref<8x8x64xf32, #tpu.memory_space<vmem>>, vector<8x8x64xf32>
    tpu.vector_store %arg5[%c0_22, %c0_23, %c0_24], %33 {strides = array<i32>} : memref<8x8x64xf32, #tpu.memory_space<vmem>>, vector<8x8x64xf32>,
    %c0_i32_25 = arith.constant 0 : i32
    %35 = arith.cmpi eq, %arg1, %c0_i32_25 : i32
    %36 = arith.extui %35 : i1 to i32
    %c0_i32_26 = arith.constant 0 : i32
    %37 = arith.cmpi ne, %36, %c0_i32_26 : i32
    scf.if %37 {
      %c0_27 = arith.constant 0 : index
      %c0_28 = arith.constant 0 : index
      %c0_29 = arith.constant 0 : index
      %38 = vector.load %arg6[%c0_27, %c0_28, %c0_29] : memref<8x8x1xf32, #tpu.memory_space<vmem>>, vector<8x8x1xf32>
      %cst_30 = arith.constant 1.000000e+00 : f32
      %39 = vector.broadcast %cst_30 : f32 to vector<8x8x1xf32>
      %40 = arith.maximumf %38, %39 : vector<8x8x1xf32>
      %cst_31 = arith.constant 1.600000e+01 : f32
      %41 = vector.broadcast %cst_31 : f32 to vector<8x8x1xf32>
      %42 = arith.mulf %41, %40 : vector<8x8x1xf32>
      %cst_32 = arith.constant 1.000000e+00 : f32
      %43 = vector.broadcast %cst_32 : f32 to vector<8x8x1xf32>
      %44 = arith.divf %43, %42 : vector<8x8x1xf32>
      %c0_33 = arith.constant 0 : index
      %c0_34 = arith.constant 0 : index
      %c0_35 = arith.constant 0 : index
      %45 = vector.load %arg5[%c0_33, %c0_34, %c0_35] : memref<8x8x64xf32, #tpu.memory_space<vmem>>, vector<8x8x64xf32>
      %46 = vector.broadcast %44 : vector<8x8x1xf32> to vector<8x8x64xf32>
      %47 = arith.mulf %45, %46 : vector<8x8x64xf32>
      %cst_36 = arith.constant dense<0.000000e+00> : vector<8x64xf32>
      %48 = vector.multi_reduction <add>, %47, %cst_36 [1] : vector<8x8x64xf32> to vector<8x64xf32>
      %c0_37 = arith.constant 0 : index
      %c0_38 = arith.constant 0 : index
      %49 = vector.load %arg4[%c0_37, %c0_38] : memref<8x64xf32, #tpu.memory_space<vmem>>, vector<8x64xf32>
      tpu.vector_store %arg4[%c0_37, %c0_38], %48 {strides = array<i32>} : memref<8x64xf32, #tpu.memory_space<vmem>>, vector<8x64xf32>,
    } else {
    }
    return
  }
  func.func @transform_0(%arg0: i32, %arg1: i32) -> (i32, i32, i32, i32) {
    %c0_i32 = arith.constant 0 : i32
    %c0_i32_0 = arith.constant 0 : i32
    %c0_i32_1 = arith.constant 0 : i32
    return %arg0, %c0_i32, %c0_i32_0, %arg1 : i32, i32, i32, i32
  }
  func.func @transform_1(%arg0: i32, %arg1: i32) -> (i32, i32) {
    %c0_i32 = arith.constant 0 : i32
    %c0_i32_0 = arith.constant 0 : i32
    %c0_i32_1 = arith.constant 0 : i32
    return %c0_i32, %c0_i32_0 : i32, i32
  }
  func.func @transform_2(%arg0: i32, %arg1: i32) -> (i32, i32) {
    %c0_i32 = arith.constant 0 : i32
    %c0_i32_0 = arith.constant 0 : i32
    return %arg0, %c0_i32 : i32, i32
  }
}

</mosaic_0001>

<bundles_post_ra>
// kernel: tpu_custom_call.1
= control target key start
LH: loop header
LB: loop body
LE: loop exit
PB: predicated region body
PF: predicated region fallthrough
CT: control target
= control target key end

     0   :  { %v2884_v3 = vmov 0.0|0.0   ;;  %vm16_vm0 = vcmask 523264   ;;  %vm2885_vm1 = vmmov 0   ;;  %v2886_v12 = vmov 0.0   ;;  %s3730_s0 = inlined_call_operand.vmem [shape: f32[12,2,64,32], index: 0, kind: input, shape index: {}]   ;;  %s3731_s1 = inlined_call_operand.vmem [shape: f32[8,64], index: 1, kind: input, shape index: {}]   ;;  %s3732_s2 = inlined_call_operand.hbm [shape: f32[8,64], index: 2, kind: output, shape index: {}]  }
   0x1   :  { %v34_v0 = vld [vmem:[%s3730_s0] sm:$0xff]  ;;  %v35_v1 = vld [vmem:[%s3730_s0 + $0x8] sm:$0xff]  ;;  %2613 = vmatprep.subr.bf16.mxu0 %v2884_v3  ;;  %2625 = vmatprep.subr.bf16.mxu1 %v2884_v3  ;;  %v36_v11 = vld [vmem:[%s3730_s0 + $0x10] sm:$0xff]  ;;  %17 = vst.msk [vmem:[#allocation2] sm:$0xff] %vm16_vm0, %v2886_v12 }
   0x2   :  { %v2013_v2 = vld [vmem:[%s3730_s0 + $0x40] sm:$0xff]  ;;  %v2014_v4 = vld [vmem:[%s3730_s0 + $0x48] sm:$0xff]  ;;  %2325 = vmatprep.mubr.msk.f32.mxu0 %vm2885_vm1, %v2886_v12  ;;  %2344 = vmatprep.mubr.msk.f32.mxu1 %vm2885_vm1, %v2886_v12  ;;  %18 = vst.msk [vmem:[#allocation2 + $0x8] sm:$0xff] %vm16_vm0, %v2886_v12  ;;  %19 = vst.msk [vmem:[#allocation2 + $0x10] sm:$0xff] %vm16_vm0, %v2886_v12 }
   0x3   :  { %v163_v5 = vadd.f32 %v2013_v2, %v34_v0  ;;  %v42_v6 = vld [vmem:[%s3730_s0 + $0x80] sm:$0xff]  ;;  %v43_v7 = vld [vmem:[%s3730_s0 + $0x88] sm:$0xff]  ;;  %v164_v8 = vadd.f32 %v2014_v4, %v35_v1  ;;  %20 = vst.msk [vmem:[#allocation2 + $0x18] sm:$0xff] %vm16_vm0, %v2886_v12  ;;  %21 = vst.msk [vmem:[#allocation2 + $0x20] sm:$0xff] %vm16_vm0, %v2886_v12 }
   0x4   :  { %v2021_v9 = vld [vmem:[%s3730_s0 + $0xc0] sm:$0xff]  ;;  %v2022_v10 = vld [vmem:[%s3730_s0 + $0xc8] sm:$0xff]  ;;  %22 = vst.msk [vmem:[#allocation2 + $0x28] sm:$0xff] %vm16_vm0, %v2886_v12  ;;  %23 = vst.msk [vmem:[#allocation2 + $0x30] sm:$0xff] %vm16_vm0, %v2886_v12 }
   0x5   :  { %24 = vst.msk [vmem:[#allocation2 + $0x38] sm:$0xff] %vm16_vm0, %v2886_v12  ;;  %v171_v13 = vadd.f32 %v2021_v9, %v42_v6  ;;  %v172_v14 = vadd.f32 %v2022_v10, %v43_v7  ;;  %v37_v15 = vld [vmem:[%s3730_s0 + $0x18] sm:$0xff]  ;;  %v2015_v16 = vld [vmem:[%s3730_s0 + $0x50] sm:$0xff]  ;;  %v2962_v18 = vpack.c.bf16 %v164_v8, %v163_v5  ;;  %v38_v27 = vld [vmem:[%s3730_s0 + $0x20] sm:$0xff] }
   0x6   :  { %v2016_v17 = vld [vmem:[%s3730_s0 + $0x58] sm:$0xff]  ;;  %v165_v19 = vadd.f32 %v2015_v16, %v36_v11  ;;  %v44_v21 = vld [vmem:[%s3730_s0 + $0x90] sm:$0xff]  ;;  %v39_v28 = vld [vmem:[%s3730_s0 + $0x28] sm:$0xff] }
   0x7   :  { %v166_v20 = vadd.f32 %v2016_v17, %v37_v15  ;;  %v45_v22 = vld [vmem:[%s3730_s0 + $0x98] sm:$0xff]  ;;  %v2023_v23 = vld [vmem:[%s3730_s0 + $0xd0] sm:$0xff]  ;;  %v2973_v24 = vpack.c.bf16 %v172_v14, %v171_v13  ;;  %2615 = vmatpush3.bf16.msra.mxu0 %v2962_v18  ;;  %v2017_v31 = vld [vmem:[%s3730_s0 + $0x60] sm:$0xff] }
   0x8   :  { %v2024_v25 = vld [vmem:[%s3730_s0 + $0xd8] sm:$0xff]  ;;  %v173_v26 = vadd.f32 %v2023_v23, %v44_v21  ;;  %v2018_v32 = vld [vmem:[%s3730_s0 + $0x68] sm:$0xff]  ;;  %v46_v33 = vld [vmem:[%s3730_s0 + $0xa0] sm:$0xff]  ;;  %2616 = vmatprep.subr.bf16.mxu0 %v2884_v3  ;;  %v167_v34 = vadd.f32 %v2017_v31, %v38_v27 }
   0x9   :  { %v2985_v29 = vpack.c.bf16 %v166_v20, %v165_v19  ;;  %v174_v30 = vadd.f32 %v2024_v25, %v45_v22  ;;  %2627 = vmatpush3.bf16.msra.mxu1 %v2973_v24  ;;  %v168_v35 = vadd.f32 %v2018_v32, %v39_v28  ;;  %v47_v36 = vld [vmem:[%s3730_s0 + $0xa8] sm:$0xff]  ;;  %v2025_v37 = vld [vmem:[%s3730_s0 + $0xe0] sm:$0xff]  ;;  %v40_v42 = vld [vmem:[%s3730_s0 + $0x30] sm:$0xff] }
   0xa   :  { %v2026_v38 = vld [vmem:[%s3730_s0 + $0xe8] sm:$0xff]  ;;  %2628 = vmatprep.subr.bf16.mxu1 %v2884_v3  ;;  %v175_v40 = vadd.f32 %v2025_v37, %v46_v33  ;;  %v41_v43 = vld [vmem:[%s3730_s0 + $0x38] sm:$0xff]  ;;  %v2019_v44 = vld [vmem:[%s3730_s0 + $0x70] sm:$0xff] }
   0xb   :  { %v3008_v39 = vpack.c.bf16 %v174_v30, %v173_v26  ;;  %v176_v41 = vadd.f32 %v2026_v38, %v47_v36  ;;  %v2020_v45 = vld [vmem:[%s3730_s0 + $0x78] sm:$0xff]  ;;  %v48_v46 = vld [vmem:[%s3730_s0 + $0xb0] sm:$0xff]  ;;  %2618 = vmatpush3.bf16.msra.mxu0 %v2985_v29  ;;  %v3029_v48 = vpack.c.bf16 %v168_v35, %v167_v34  ;;  %v169_v49 = vadd.f32 %v2019_v44, %v40_v42  ;;  %v50_v56 = vld [vmem:[%s3730_s0 + $0x100] sm:$0xff] }
   0xc   :  { %v49_v47 = vld [vmem:[%s3730_s0 + $0xb8] sm:$0xff]  ;;  %v170_v50 = vadd.f32 %v2020_v45, %v41_v43  ;;  %v2027_v51 = vld [vmem:[%s3730_s0 + $0xf0] sm:$0xff]  ;;  %2619 = vmatprep.subr.bf16.mxu0 %v2884_v3  ;;  %v51_v57 = vld [vmem:[%s3730_s0 + $0x108] sm:$0xff] }
   0xd   :  { %v2028_v52 = vld [vmem:[%s3730_s0 + $0xf8] sm:$0xff]  ;;  %2630 = vmatpush3.bf16.msra.mxu1 %v3008_v39  ;;  %v3039_v53 = vpack.c.bf16 %v176_v41, %v175_v40  ;;  %v177_v54 = vadd.f32 %v2027_v51, %v48_v46  ;;  %v2029_v58 = vld [vmem:[%s3730_s0 + $0x140] sm:$0xff]  ;;  %v2030_v59 = vld [vmem:[%s3730_s0 + $0x148] sm:$0xff] }
   0xe   :  { %v178_v55 = vadd.f32 %v2028_v52, %v49_v47  ;;  %2631 = vmatprep.subr.bf16.mxu1 %v2884_v3  ;;  %v58_v60 = vld [vmem:[%s3730_s0 + $0x180] sm:$0xff]  ;;  %v59_v61 = vld [vmem:[%s3730_s0 + $0x188] sm:$0xff]  ;;  %v3067_v0 = vpack.c.bf16 %v170_v50, %v169_v49  ;;  %v179_v1 = vadd.f32 %v2029_v58, %v50_v56  ;;  %v180_v2 = vadd.f32 %v2030_v59, %v51_v57  ;;  %v52_v4 = vld [vmem:[%s3730_s0 + $0x110] sm:$0xff] }
   0xf   :  { %v2037_v62 = vld [vmem:[%s3730_s0 + $0x1c0] sm:$0xff]  ;;  %v2038_v63 = vld [vmem:[%s3730_s0 + $0x1c8] sm:$0xff]  ;;  %2621 = vmatpush3.bf16.msra.mxu0 %v3029_v48  ;;  %v53_v5 = vld [vmem:[%s3730_s0 + $0x118] sm:$0xff] }
  0x10   :  { %2622 = vmatprep.subr.bf16.mxu0 %v2884_v3  ;;  %v3077_v6 = vpack.c.bf16 %v178_v55, %v177_v54  ;;  %v187_v7 = vadd.f32 %v2037_v62, %v58_v60  ;;  %v188_v8 = vadd.f32 %v2038_v63, %v59_v61  ;;  %v2031_v9 = vld [vmem:[%s3730_s0 + $0x150] sm:$0xff]  ;;  %v2032_v10 = vld [vmem:[%s3730_s0 + $0x158] sm:$0xff]  ;;  %v3102_v16 = vld [vmem:[%s3731_s1] sm:$0xff]  ;;  %v3104_v17 = vpack.c.bf16 %v180_v2, %v179_v1 }
  0x11   :  { %2633 = vmatpush3.bf16.msra.mxu1 %v3039_v53  ;;  %v60_v11 = vld [vmem:[%s3730_s0 + $0x190] sm:$0xff]  ;;  %v61_v13 = vld [vmem:[%s3730_s0 + $0x198] sm:$0xff]  ;;  %v181_v19 = vadd.f32 %v2031_v9, %v52_v4  ;;  %v182_v20 = vadd.f32 %v2032_v10, %v53_v5  ;;  %v54_v21 = vld [vmem:[%s3730_s0 + $0x120] sm:$0xff] }
  0x12   :  { %2634 = vmatprep.subr.bf16.mxu1 %v2884_v3  ;;  %v2039_v14 = vld [vmem:[%s3730_s0 + $0x1d0] sm:$0xff]  ;;  %v2040_v15 = vld [vmem:[%s3730_s0 + $0x1d8] sm:$0xff]  ;;  %v55_v22 = vld [vmem:[%s3730_s0 + $0x128] sm:$0xff]  ;;  %v3114_v23 = vpack.c.bf16 %v188_v8, %v187_v7 }
  0x13   :  { %2624 = vmatpush3.bf16.msra.mxu0 %v3067_v0  ;;  %v189_v25 = vadd.f32 %v2039_v14, %v60_v11  ;;  %v190_v26 = vadd.f32 %v2040_v15, %v61_v13  ;;  %v2033_v27 = vld [vmem:[%s3730_s0 + $0x160] sm:$0xff]  ;;  %v2034_v28 = vld [vmem:[%s3730_s0 + $0x168] sm:$0xff]  ;;  %v3140_v34 = vpack.c.bf16 %v182_v20, %v181_v19  ;;  %v56_v37 = vld [vmem:[%s3730_s0 + $0x130] sm:$0xff] }
  0x14   :  { %2637 = vmatprep.subr.bf16.mxu0 %v2884_v3  ;;  %v62_v30 = vld [vmem:[%s3730_s0 + $0x1a0] sm:$0xff]  ;;  %v63_v31 = vld [vmem:[%s3730_s0 + $0x1a8] sm:$0xff]  ;;  %v183_v35 = vadd.f32 %v2033_v27, %v54_v21  ;;  %v184_v36 = vadd.f32 %v2034_v28, %v55_v22  ;;  %v57_v38 = vld [vmem:[%s3730_s0 + $0x138] sm:$0xff] }
  0x15   :  { %2636 = vmatpush3.bf16.msra.mxu1 %v3077_v6  ;;  %v2041_v32 = vld [vmem:[%s3730_s0 + $0x1e0] sm:$0xff]  ;;  %v2042_v33 = vld [vmem:[%s3730_s0 + $0x1e8] sm:$0xff]  ;;  %v3150_v40 = vpack.c.bf16 %v190_v26, %v189_v25  ;;  %v2035_v43 = vld [vmem:[%s3730_s0 + $0x170] sm:$0xff] }
  0x16   :  { %2649 = vmatprep.subr.bf16.mxu1 %v2884_v3  ;;  %2326 = vmatmul.mubr.msk.f32.vlgmr.msra.gmra.mrb[0].mxu0 %vm16_vm0, %v3102_v16  ;;  %v191_v41 = vadd.f32 %v2041_v32, %v62_v30  ;;  %v192_v42 = vadd.f32 %v2042_v33, %v63_v31  ;;  %v2036_v44 = vld [vmem:[%s3730_s0 + $0x178] sm:$0xff]  ;;  %v64_v45 = vld [vmem:[%s3730_s0 + $0x1b0] sm:$0xff]  ;;  %v3176_v50 = vpack.c.bf16 %v184_v36, %v183_v35  ;;  %v66_v54 = vld [vmem:[%s3730_s0 + $0x200] sm:$0xff] }
  0x17   :  { %2639 = vmatpush3.bf16.msra.mxu0 %v3104_v17  ;;  %v65_v46 = vld [vmem:[%s3730_s0 + $0x1b8] sm:$0xff]  ;;  %v2043_v47 = vld [vmem:[%s3730_s0 + $0x1f0] sm:$0xff]  ;;  %2363 = vmatprep.mubr.msk.f32.mxu0 %vm2885_vm1, %v2886_v12  ;;  %v185_v51 = vadd.f32 %v2035_v43, %v56_v37  ;;  %v186_v52 = vadd.f32 %v2036_v44, %v57_v38  ;;  %v67_v55 = vld [vmem:[%s3730_s0 + $0x208] sm:$0xff] }
  0x18   :  { %2345 = vmatmul.mubr.msk.f32.vlgmr.msra.gmra.mrb[0].mxu1 %vm16_vm0, %v3102_v16  ;;  %2640 = vmatprep.subr.bf16.mxu0 %v2884_v3  ;;  %v2044_v49 = vld [vmem:[%s3730_s0 + $0x1f8] sm:$0xff]  ;;  %v3186_v56 = vpack.c.bf16 %v192_v42, %v191_v41  ;;  %v193_v57 = vadd.f32 %v2043_v47, %v64_v45  ;;  %v2045_v59 = vld [vmem:[%s3730_s0 + $0x240] sm:$0xff]  ;;  %v2046_v60 = vld [vmem:[%s3730_s0 + $0x248] sm:$0xff] }
  0x19   :  { %2651 = vmatpush3.bf16.msra.mxu1 %v3114_v23  ;;  %2382 = vmatprep.mubr.msk.f32.mxu1 %vm2885_vm1, %v2886_v12  ;;  %v194_v58 = vadd.f32 %v2044_v49, %v65_v46  ;;  %v74_v61 = vld [vmem:[%s3730_s0 + $0x280] sm:$0xff]  ;;  %v75_v62 = vld [vmem:[%s3730_s0 + $0x288] sm:$0xff]  ;;  %v3208_v2 = vpack.c.bf16 %v186_v52, %v185_v51  ;;  %v195_v4 = vadd.f32 %v2045_v59, %v66_v54  ;;  %v68_v7 = vld [vmem:[%s3730_s0 + $0x210] sm:$0xff] }
  0x1a   :  { %2652 = vmatprep.subr.bf16.mxu1 %v2884_v3  ;;  %v2053_v63 = vld [vmem:[%s3730_s0 + $0x2c0] sm:$0xff]  ;;  %v2054_v1 = vld [vmem:[%s3730_s0 + $0x2c8] sm:$0xff]  ;;  %v196_v5 = vadd.f32 %v2046_v60, %v67_v55  ;;  %v69_v8 = vld [vmem:[%s3730_s0 + $0x218] sm:$0xff] }
  0x1b   :  { %2642 = vmatpush3.bf16.msra.mxu0 %v3140_v34  ;;  %v3218_v9 = vpack.c.bf16 %v194_v58, %v193_v57  ;;  %v203_v10 = vadd.f32 %v2053_v63, %v74_v61  ;;  %v204_v11 = vadd.f32 %v2054_v1, %v75_v62  ;;  %v2047_v13 = vld [vmem:[%s3730_s0 + $0x250] sm:$0xff]  ;;  %v2048_v14 = vld [vmem:[%s3730_s0 + $0x258] sm:$0xff]  ;;  %v70_v27 = vld [vmem:[%s3730_s0 + $0x220] sm:$0xff] }
  0x1c   :  { %2643 = vmatprep.subr.bf16.mxu0 %v2884_v3  ;;  %v76_v15 = vld [vmem:[%s3730_s0 + $0x290] sm:$0xff]  ;;  %v77_v19 = vld [vmem:[%s3730_s0 + $0x298] sm:$0xff]  ;;  %v3240_v22 = vpack.c.bf16 %v196_v5, %v195_v4  ;;  %v197_v25 = vadd.f32 %v2047_v13, %v68_v7  ;;  %v198_v26 = vadd.f32 %v2048_v14, %v69_v8  ;;  %v71_v28 = vld [vmem:[%s3730_s0 + $0x228] sm:$0xff] }
  0x1d   :  { %2654 = vmatpush3.bf16.msra.mxu1 %v3150_v40  ;;  %v2055_v20 = vld [vmem:[%s3730_s0 + $0x2d0] sm:$0xff]  ;;  %v2056_v21 = vld [vmem:[%s3730_s0 + $0x2d8] sm:$0xff]  ;;  %v3250_v30 = vpack.c.bf16 %v204_v11, %v203_v10  ;;  %v2049_v33 = vld [vmem:[%s3730_s0 + $0x260] sm:$0xff] }
  0x1e   :  { %2655 = vmatprep.subr.bf16.mxu1 %v2884_v3  ;;  %v205_v31 = vadd.f32 %v2055_v20, %v76_v15  ;;  %v206_v32 = vadd.f32 %v2056_v21, %v77_v19  ;;  %v2050_v35 = vld [vmem:[%s3730_s0 + $0x268] sm:$0xff]  ;;  %v78_v36 = vld [vmem:[%s3730_s0 + $0x2a0] sm:$0xff]  ;;  %v3276_v42 = vpack.c.bf16 %v198_v26, %v197_v25  ;;  %v199_v43 = vadd.f32 %v2049_v33, %v70_v27  ;;  %v72_v45 = vld [vmem:[%s3730_s0 + $0x230] sm:$0xff] }
  0x1f   :  { %2645 = vmatpush3.bf16.msra.mxu0 %v3176_v50  ;;  %v79_v37 = vld [vmem:[%s3730_s0 + $0x2a8] sm:$0xff]  ;;  %v2057_v38 = vld [vmem:[%s3730_s0 + $0x2e0] sm:$0xff]  ;;  %v200_v44 = vadd.f32 %v2050_v35, %v71_v28  ;;  %v73_v46 = vld [vmem:[%s3730_s0 + $0x238] sm:$0xff] }
  0x20   :  { %2646 = vmatprep.subr.bf16.mxu0 %v2884_v3  ;;  %v2058_v41 = vld [vmem:[%s3730_s0 + $0x2e8] sm:$0xff]  ;;  %v3286_v47 = vpack.c.bf16 %v206_v32, %v205_v31  ;;  %v207_v49 = vadd.f32 %v2057_v38, %v78_v36  ;;  %v2051_v52 = vld [vmem:[%s3730_s0 + $0x270] sm:$0xff]  ;;  %v2052_v54 = vld [vmem:[%s3730_s0 + $0x278] sm:$0xff] }
  0x21   :  { %2657 = vmatpush3.bf16.msra.mxu1 %v3186_v56  ;;  %v208_v51 = vadd.f32 %v2058_v41, %v79_v37  ;;  %v80_v55 = vld [vmem:[%s3730_s0 + $0x2b0] sm:$0xff]  ;;  %v81_v57 = vld [vmem:[%s3730_s0 + $0x2b8] sm:$0xff]  ;;  %v3312_v60 = vpack.c.bf16 %v200_v44, %v199_v43  ;;  %v201_v61 = vadd.f32 %v2051_v52, %v72_v45  ;;  %v202_v62 = vadd.f32 %v2052_v54, %v73_v46  ;;  %v82_v63 = vld [vmem:[%s3730_s0 + $0x300] sm:$0xff] }
  0x22   :  { %2658 = vmatprep.subr.bf16.mxu1 %v2884_v3  ;;  %v2059_v58 = vld [vmem:[%s3730_s0 + $0x2f0] sm:$0xff]  ;;  %v2060_v59 = vld [vmem:[%s3730_s0 + $0x2f8] sm:$0xff]  ;;  %v83_v1 = vld [vmem:[%s3730_s0 + $0x308] sm:$0xff] }
  0x23   :  { %2648 = vmatpush3.bf16.msra.mxu0 %v3208_v2  ;;  %v2061_v4 = vld [vmem:[%s3730_s0 + $0x340] sm:$0xff]  ;;  %v3325_v5 = vpack.c.bf16 %v208_v51, %v207_v49  ;;  %v209_v7 = vadd.f32 %v2059_v58, %v80_v55  ;;  %v210_v8 = vadd.f32 %v2060_v59, %v81_v57  ;;  %v2062_v10 = vld [vmem:[%s3730_s0 + $0x348] sm:$0xff] }
  0x24   :  { %2661 = vmatprep.subr.bf16.mxu0 %v2884_v3  ;;  %v90_v11 = vld [vmem:[%s3730_s0 + $0x380] sm:$0xff]  ;;  %v91_v13 = vld [vmem:[%s3730_s0 + $0x388] sm:$0xff] }
  0x25   :  { %2660 = vmatpush3.bf16.msra.mxu1 %v3218_v9  ;;  %v2069_v14 = vld [vmem:[%s3730_s0 + $0x3c0] sm:$0xff]  ;;  %v2070_v15 = vld [vmem:[%s3730_s0 + $0x3c8] sm:$0xff] }
  0x26   :  { %2673 = vmatprep.subr.bf16.mxu1 %v2884_v3  ;;  %2364 = vmatmul.mubr.msk.f32.vlgmr.msra.gmra.mrb[2].mxu0 %vm16_vm0, %v3102_v16 }
  0x27   :  { %2663 = vmatpush3.bf16.msra.mxu0 %v3240_v22  ;;  %2401 = vmatprep.mubr.msk.f32.mxu0 %vm2885_vm1, %v2886_v12 }
  0x28   :  { %2383 = vmatmul.mubr.msk.f32.vlgmr.msra.gmra.mrb[2].mxu1 %vm16_vm0, %v3102_v16  ;;  %2664 = vmatprep.subr.bf16.mxu0 %v2884_v3 }
  0x29   :  { %2675 = vmatpush3.bf16.msra.mxu1 %v3250_v30  ;;  %2420 = vmatprep.mubr.msk.f32.mxu1 %vm2885_vm1, %v2886_v12 }
  0x2a   :  { %2676 = vmatprep.subr.bf16.mxu1 %v2884_v3 }
  0x2b   :  { %2666 = vmatpush3.bf16.msra.mxu0 %v3276_v42 }
  0x2c   :  { %2667 = vmatprep.subr.bf16.mxu0 %v2884_v3 }
  0x2d   :  { %2678 = vmatpush3.bf16.msra.mxu1 %v3286_v47 }
  0x2e   :  { %2679 = vmatprep.subr.bf16.mxu1 %v2884_v3 }
  0x2f   :  { %7 = vsyncpa [#allocation5], 0  ;;  %2669 = vmatpush3.bf16.msra.mxu0 %v3312_v60  ;;  %v3344_v19 = vpack.c.bf16 %v202_v62, %v201_v61  ;;  %v211_v20 = vadd.f32 %v2061_v4, %v82_v63  ;;  %v212_v21 = vadd.f32 %v2062_v10, %v83_v1  ;;  %v84_v25 = vld [vmem:[%s3730_s0 + $0x310] sm:$0xff]  ;;  %v85_v26 = vld [vmem:[%s3730_s0 + $0x318] sm:$0xff]  ;;  %v3354_v27 = vpack.c.bf16 %v210_v8, %v209_v7 }
  0x30   :  { %2670 = vmatprep.subr.bf16.mxu0 %v2884_v3  ;;  %v219_v28 = vadd.f32 %v2069_v14, %v90_v11  ;;  %v220_v31 = vadd.f32 %v2070_v15, %v91_v13  ;;  %v2063_v32 = vld [vmem:[%s3730_s0 + $0x350] sm:$0xff]  ;;  %v2064_v33 = vld [vmem:[%s3730_s0 + $0x358] sm:$0xff]  ;;  %v86_v45 = vld [vmem:[%s3730_s0 + $0x320] sm:$0xff]  ;;  %vm792_vm2 = vcmask 261120   ;;  %vm25_vm4 = vcmask 7168  }
  0x31   :  { %2681 = vmatpush3.bf16.msra.mxu1 %v3325_v5  ;;  %v92_v35 = vld [vmem:[%s3730_s0 + $0x390] sm:$0xff]  ;;  %v93_v36 = vld [vmem:[%s3730_s0 + $0x398] sm:$0xff]  ;;  %v3376_v41 = vpack.c.bf16 %v212_v21, %v211_v20  ;;  %v213_v43 = vadd.f32 %v2063_v32, %v84_v25  ;;  %v214_v44 = vadd.f32 %v2064_v33, %v85_v26  ;;  %v87_v46 = vld [vmem:[%s3730_s0 + $0x328] sm:$0xff]  ;;  %26 = vst.msk [vmem:[#allocation3] sm:$0xff] %vm25_vm4, %v2886_v12 }
  0x32   :  { %2682 = vmatprep.subr.bf16.mxu1 %v2884_v3  ;;  %v2071_v37 = vld [vmem:[%s3730_s0 + $0x3d0] sm:$0xff]  ;;  %v2072_v38 = vld [vmem:[%s3730_s0 + $0x3d8] sm:$0xff]  ;;  %v3386_v49 = vpack.c.bf16 %v220_v31, %v219_v28  ;;  %v2065_v54 = vld [vmem:[%s3730_s0 + $0x360] sm:$0xff]  ;;  %27 = vst.msk [vmem:[#allocation3 + $0x8] sm:$0xff] %vm25_vm4, %v2886_v12 }
  0x33   :  { %2672 = vmatpush3.bf16.msra.mxu0 %v3344_v19  ;;  %v221_v51 = vadd.f32 %v2071_v37, %v92_v35  ;;  %v222_v52 = vadd.f32 %v2072_v38, %v93_v36  ;;  %v2066_v55 = vld [vmem:[%s3730_s0 + $0x368] sm:$0xff]  ;;  %v94_v57 = vld [vmem:[%s3730_s0 + $0x3a0] sm:$0xff]  ;;  %v3412_v62 = vpack.c.bf16 %v214_v44, %v213_v43  ;;  %v215_v63 = vadd.f32 %v2065_v54, %v86_v45  ;;  %v88_v4 = vld [vmem:[%s3730_s0 + $0x330] sm:$0xff] }
  0x34   :  { %2685 = vmatprep.subr.bf16.mxu0 %v2884_v3  ;;  %v95_v58 = vld [vmem:[%s3730_s0 + $0x3a8] sm:$0xff]  ;;  %v2073_v59 = vld [vmem:[%s3730_s0 + $0x3e0] sm:$0xff]  ;;  %v216_v1 = vadd.f32 %v2066_v55, %v87_v46  ;;  %v89_v7 = vld [vmem:[%s3730_s0 + $0x338] sm:$0xff]  ;;  %28 = vst.msk [vmem:[#allocation3 + $0x10] sm:$0xff] %vm25_vm4, %v2886_v12  ;;  %v849_v45 = vlaneseq }
  0x35   :  { %2684 = vmatpush3.bf16.msra.mxu1 %v3354_v27  ;;  %v2074_v61 = vld [vmem:[%s3730_s0 + $0x3e8] sm:$0xff]  ;;  %v3422_v8 = vpack.c.bf16 %v222_v52, %v221_v51  ;;  %v223_v10 = vadd.f32 %v2073_v59, %v94_v57  ;;  %v2067_v13 = vld [vmem:[%s3730_s0 + $0x370] sm:$0xff]  ;;  %v2068_v14 = vld [vmem:[%s3730_s0 + $0x378] sm:$0xff]  ;;  %29 = vst.msk [vmem:[#allocation3 + $0x18] sm:$0xff] %vm25_vm4, %v2886_v12 }
  0x36   :  { %2697 = vmatprep.subr.bf16.mxu1 %v2884_v3  ;;  %2402 = vmatmul.mubr.msk.f32.vlgmr.msra.gmra.mrb[4].mxu0 %vm16_vm0, %v3102_v16  ;;  %v224_v11 = vadd.f32 %v2074_v61, %v95_v58  ;;  %v96_v15 = vld [vmem:[%s3730_s0 + $0x3b0] sm:$0xff]  ;;  %v97_v20 = vld [vmem:[%s3730_s0 + $0x3b8] sm:$0xff]  ;;  %v3448_v26 = vpack.c.bf16 %v216_v1, %v215_v63  ;;  %v217_v28 = vadd.f32 %v2067_v13, %v88_v4  ;;  %vm3477_vm3 = vmpackc.low %vm792_vm2, %vm792_vm2  ;;  %v3531_v55 = vshrl.u32 %v849_v45, 7 }
  0x37   :  { %2687 = vmatpush3.bf16.msra.mxu0 %v3376_v41  ;;  %v2075_v21 = vld [vmem:[%s3730_s0 + $0x3f0] sm:$0xff]  ;;  %v2076_v25 = vld [vmem:[%s3730_s0 + $0x3f8] sm:$0xff]  ;;  %2439 = vmatprep.mubr.msk.f32.mxu0 %vm2885_vm1, %v2886_v12  ;;  %v218_v31 = vadd.f32 %v2068_v14, %v89_v7  ;;  %30 = vst.msk [vmem:[#allocation3 + $0x20] sm:$0xff] %vm25_vm4, %v2886_v12  ;;  %31 = vst.msk [vmem:[#allocation3 + $0x28] sm:$0xff] %vm25_vm4, %v2886_v12  ;;  %s2888_s0 = smov [#allocation4]  }
  0x38   :  { %2421 = vmatmul.mubr.msk.f32.vlgmr.msra.gmra.mrb[4].mxu1 %vm16_vm0, %v3102_v16  ;;  %2688 = vmatprep.subr.bf16.mxu0 %v2884_v3  ;;  %v3452_v32 = vpack.c.bf16 %v224_v11, %v223_v10  ;;  %v225_v33 = vadd.f32 %v2075_v21, %v96_v15  ;;  %v226_v35 = vadd.f32 %v2076_v25, %v97_v20  ;;  %s2005_s9 = sshll.u32 %s2888_s0, 4  ;;  %s2006_s9 = int_to_ptr.vmem [resolvable:$true] %s2005_s9 }
  0x39   :  { %2699 = vmatpush3.bf16.msra.mxu1 %v3386_v49  ;;  %2458 = vmatprep.mubr.msk.f32.mxu1 %vm2885_vm1, %v2886_v12  ;;  %v3456_v36 = vpack.c.bf16 %v218_v31, %v217_v28  ;;  %32 = vst.msk [vmem:[#allocation3 + $0x30] sm:$0xff] %vm25_vm4, %v2886_v12  ;;  %33 = vst.msk [vmem:[#allocation3 + $0x38] sm:$0xff] %vm25_vm4, %v2886_v12  ;;  %s2860_s10 = scalar_lea.vmem %s2006_s9, 128  ;;  %p2865_p1 = scmp.lt.s32.totalorder %s2006_s9, %s2006_s9 }
  0x3a   :  { %2700 = vmatprep.subr.bf16.mxu1 %v2884_v3  ;;  %v3460_v37 = vpack.c.bf16 %v226_v35, %v225_v33  ;;  %p2861_p0 = scmp.ne.s32.totalorder %s2006_s9, %s2860_s10  ;;  %p2866_p2 = scmp.lt.s32.totalorder %s2860_s10, %s2860_s10 }
  0x3b   :  { %2690 = vmatpush3.bf16.msra.mxu0 %v3412_v62 }
  0x3c   :  { %2691 = vmatprep.subr.bf16.mxu0 %v2884_v3  ;;  %v974_v38 = vld [vmem:[#allocation3 + $0x18] sm:$0xff]  ;;  %p2867_p3 = por %p2866_p2, %p2865_p1 }
  0x3d   :  { %2702 = vmatpush3.bf16.msra.mxu1 %v3422_v8 }
  0x3e   :  { %2703 = vmatprep.subr.bf16.mxu1 %v2884_v3  ;;  %p2868_p4 = pnand %p2867_p3, %p2861_p0 }
  0x3f   :  { %2693 = vmatpush3.bf16.msra.mxu0 %v3448_v26 }
  0x40   :  { %2694 = vmatprep.subr.bf16.mxu0 %v2884_v3 }
  0x41   :  { %2705 = vmatpush3.bf16.msra.mxu1 %v3452_v32 }
  0x42   :  { %2706 = vmatprep.subr.bf16.mxu1 %v2884_v3 }
  0x43   :  { %2696 = vmatpush3.bf16.msra.mxu0 %v3456_v36 }
  0x44   :  { %2709 = vmatprep.subr.bf16.mxu0 %v2884_v3 }
  0x45   :  { %2708 = vmatpush3.bf16.msra.mxu1 %v3460_v37 }
  0x46   :  { %2725 = vmatprep.subr.bf16.mxu1 %v2884_v3  ;;  %2440 = vmatmul.mubr.msk.f32.vlgmr.msra.gmra.mrb[6].mxu0 %vm16_vm0, %v3102_v16 }
  0x47   :  { %2477 = vmatprep.mubr.msk.f32.mxu0 %vm2885_vm1, %v2886_v12 }
  0x48   :  { %2459 = vmatmul.mubr.msk.f32.vlgmr.msra.gmra.mrb[6].mxu1 %vm16_vm0, %v3102_v16 }
  0x49   :  { %2496 = vmatprep.mubr.msk.f32.mxu1 %vm2885_vm1, %v2886_v12 }
  0x4c   :  { %2712 = vmatpush3.bf16.xpose.msk.msra.mxu0 %vm3477_vm3, %v2962_v18 }
  0x4d   :  { %2713 = vmatprep.subr.bf16.mxu0 %v2884_v3 }
  0x4e   :  { %2728 = vmatpush3.bf16.xpose.msk.msra.mxu1 %vm3477_vm3, %v2973_v24 }
  0x4f   :  { %2729 = vmatprep.subr.bf16.mxu1 %v2884_v3 }
  0x54   :  { %2716 = vmatpush3.bf16.xpose.msk.msra.mxu0 %vm3477_vm3, %v2985_v29 }
  0x55   :  { %2717 = vmatprep.subr.bf16.mxu0 %v2884_v3 }
  0x56   :  { %2732 = vmatpush3.bf16.xpose.msk.msra.mxu1 %vm3477_vm3, %v3008_v39 }
  0x57   :  { %2733 = vmatprep.subr.bf16.mxu1 %v2884_v3 }
  0x5c   :  { %2720 = vmatpush3.bf16.xpose.msk.msra.mxu0 %vm3477_vm3, %v3029_v48 }
  0x5d   :  { %2721 = vmatprep.subr.bf16.mxu0 %v2884_v3 }
  0x5e   :  { %2736 = vmatpush3.bf16.xpose.msk.msra.mxu1 %vm3477_vm3, %v3039_v53 }
  0x5f   :  { %2737 = vmatprep.subr.bf16.mxu1 %v2884_v3 }
  0x64   :  { %2724 = vmatpush3.bf16.xpose.msk.msra.mxu0 %vm3477_vm3, %v3067_v0 }
  0x65   :  { %2741 = vmatprep.subr.bf16.mxu0 %v2884_v3 }
  0x66   :  { %2740 = vmatpush3.bf16.xpose.msk.msra.mxu1 %vm3477_vm3, %v3077_v6 }
  0x67   :  { %2757 = vmatprep.subr.bf16.mxu1 %v2884_v3 }
  0xe9   :  { %v298_v18 = vpop.f32.mrb[0].mxu0 }
  0xea   :  { %v793_v24 = vsel %vm792_vm2, %v298_v18, -inf  ;;  %v2327_v39 = vpop.f32.mrb[1].mxu0 }
  0xeb   :  { %v368_v29 = vpop.f32.mrb[0].mxu1  ;;  %v794_v48 = vrot.slane %v793_v24, 4 }
  0xec   :  { %v800_v53 = vsel %vm792_vm2, %v368_v29, -inf  ;;  %v2346_v0 = vpop.f32.mrb[1].mxu1 }
  0xed   :  { %v801_v6 = vrot.slane %v800_v53, 4  ;;  %v795_v16 = vmax.f32 %v793_v24, %v794_v48 }
  0xef   :  { %v802_v43 = vmax.f32 %v800_v53, %v801_v6  ;;  %v796_v44 = vrot.slane %v795_v16, 2 }
  0xf1   :  { %v803_v46 = vrot.slane %v802_v43, 2  ;;  %v797_v51 = vmax.f32 %v795_v16, %v796_v44 }
  0xf3   :  { %v804_v52 = vmax.f32 %v802_v43, %v803_v46  ;;  %v798_v54 = vrot.slane %v797_v51, 1 }
  0xf5   :  { %v805_v57 = vrot.slane %v804_v52, 1  ;;  %v799_v58 = vmax.f32 %v797_v51, %v798_v54 }
  0xf7   :  { %v806_v59 = vmax.f32 %v804_v52, %v805_v57  ;;  %vm851_vm5 = vcmp.ge.f32.partialorder %v298_v18, %v799_v58 }
  0xf8   :  { %v859_v61 = vsel %vm851_vm5, %v3531_v55, 8 }
  0xf9   :  { %vm852_vm6 = vcmp.ge.f32.partialorder %v368_v29, %v806_v59  ;;  %v867_v63 = vsel %vm792_vm2, %v859_v61, 2147483647  ;;  %v438_v4 = vpop.f32.mrb[2].mxu0 }
  0xfa   :  { %v860_v1 = vsel %vm852_vm6, %v3531_v55, 8  ;;  %v868_v7 = vrot.slane %v867_v63, 4  ;;  %v807_v11 = vsel %vm792_vm2, %v438_v4, -inf  ;;  %v2365_v14 = vpop.f32.mrb[3].mxu0 }
  0xfb   :  { %v877_v10 = vsel %vm792_vm2, %v860_v1, 2147483647  ;;  %v508_v13 = vpop.f32.mrb[2].mxu1  ;;  %v808_v20 = vrot.slane %v807_v11, 4 }
  0xfc   :  { %v878_v15 = vrot.slane %v877_v10, 4  ;;  %v814_v21 = vsel %vm792_vm2, %v508_v13, -inf  ;;  %v2384_v25 = vpop.f32.mrb[3].mxu1  ;;  %vm869_vm7 = vcmp.lt.s32.totalorder %v867_v63, %v868_v7 }
  0xfd   :  { %v815_v28 = vrot.slane %v814_v21, 4  ;;  %v870_v31 = vsel %vm869_vm7, %v867_v63, %v868_v7  ;;  %v809_v33 = vmax.f32 %v807_v11, %v808_v20 }
  0xfe   :  { %vm879_vm8 = vcmp.lt.s32.totalorder %v877_v10, %v878_v15  ;;  %v871_v35 = vrot.slane %v870_v31, 2 }
  0xff   :  { %v880_v18 = vsel %vm879_vm8, %v877_v10, %v878_v15  ;;  %v816_v24 = vmax.f32 %v814_v21, %v815_v28  ;;  %v810_v39 = vrot.slane %v809_v33, 2 }
 0x100   :  { %v881_v29 = vrot.slane %v880_v18, 2  ;;  %vm872_vm9 = vcmp.lt.s32.totalorder %v870_v31, %v871_v35 }
 0x101   :  { %v817_v48 = vrot.slane %v816_v24, 2  ;;  %v873_v53 = vsel %vm872_vm9, %v870_v31, %v871_v35  ;;  %v811_v0 = vmax.f32 %v809_v33, %v810_v39 }
 0x102   :  { %vm882_vm10 = vcmp.lt.s32.totalorder %v880_v18, %v881_v29  ;;  %v874_v6 = vrot.slane %v873_v53, 1 }
 0x103   :  { %v883_v16 = vsel %vm882_vm10, %v880_v18, %v881_v29  ;;  %v818_v43 = vmax.f32 %v816_v24, %v817_v48  ;;  %v812_v45 = vrot.slane %v811_v0, 1 }
 0x104   :  { %v884_v44 = vrot.slane %v883_v16, 1  ;;  %vm875_vm11 = vcmp.lt.s32.totalorder %v873_v53, %v874_v6 }
 0x105   :  { %v819_v46 = vrot.slane %v818_v43, 1  ;;  %v813_v51 = vmax.f32 %v811_v0, %v812_v45  ;;  %v876_v52 = vsel %vm875_vm11, %v873_v53, %v874_v6 }
 0x106   :  { %vm885_vm12 = vcmp.lt.s32.totalorder %v883_v16, %v884_v44  ;;  %vm947_vm13 = vcmp.eq.s32.totalorder %v3531_v55, %v876_v52 }
 0x107   :  { %v820_v54 = vmax.f32 %v818_v43, %v819_v46  ;;  %v886_v57 = vsel %vm885_vm12, %v883_v16, %v884_v44  ;;  %vm853_vm14 = vcmp.ge.f32.partialorder %v438_v4, %v813_v51  ;;  %v2085_v58 = vsel %vm947_vm13, 1.0, %v2886_v12 }
 0x108   :  { %vm948_vm15 = vcmp.eq.s32.totalorder %v3531_v55, %v886_v57  ;;  %v861_v59 = vsel %vm853_vm14, %v3531_v55, 8  ;;  %2478 = vmatmul.mubr.msk.f32.vlgmr.msra.gmra.mrb[8].mxu0 %vm792_vm2, %v2085_v58  ;;  %v979_v63 = vsel %vm792_vm2, %v2085_v58, 0.0 }
 0x109   :  { %vm854_vm5 = vcmp.ge.f32.partialorder %v508_v13, %v820_v54  ;;  %v2086_v61 = vsel %vm948_vm15, 1.0, %v2886_v12  ;;  %v887_v1 = vsel %vm792_vm2, %v861_v59, 2147483647  ;;  %2744 = vmatpush3.bf16.xpose.msk.msra.mxu0 %vm3477_vm3, %v3104_v17  ;;  %v578_v4 = vpop.f32.mrb[4].mxu0  ;;  %980 = vadd.xlane.f32.xlu0 %v979_v63 }
 0x10a   :  { %v862_v7 = vsel %vm854_vm5, %v3531_v55, 8  ;;  %2497 = vmatmul.mubr.msk.f32.vlgmr.msra.gmra.mrb[8].mxu1 %vm792_vm2, %v2086_v61  ;;  %v888_v10 = vrot.slane %v887_v1, 4  ;;  %v821_v14 = vsel %vm792_vm2, %v578_v4, -inf  ;;  %v2403_v15 = vpop.f32.mrb[5].mxu0  ;;  %2745 = vmatprep.subr.bf16.mxu0 %v2884_v3  ;;  %v982_v33 = vsel %vm792_vm2, %v2086_v61, 0.0 }
 0x10b   :  { %v897_v11 = vsel %vm792_vm2, %v862_v7, 2147483647  ;;  %2760 = vmatpush3.bf16.xpose.msk.msra.mxu1 %vm3477_vm3, %v3114_v23  ;;  %v648_v13 = vpop.f32.mrb[4].mxu1  ;;  %v822_v25 = vrot.slane %v821_v14, 4  ;;  %2515 = vmatprep.mubr.msk.f32.mxu0 %vm2885_vm1, %v2886_v12 }
 0x10c   :  { %v898_v20 = vrot.slane %v897_v11, 4  ;;  %v828_v21 = vsel %vm792_vm2, %v648_v13, -inf  ;;  %v2422_v28 = vpop.f32.mrb[5].mxu1  ;;  %2761 = vmatprep.subr.bf16.mxu1 %v2884_v3  ;;  %vm889_vm6 = vcmp.lt.s32.totalorder %v887_v1, %v888_v10  ;;  %2534 = vmatprep.mubr.msk.f32.mxu1 %vm2885_vm1, %v2886_v12 }
 0x10d   :  { %v829_v17 = vrot.slane %v828_v21, 4  ;;  %v890_v23 = vsel %vm889_vm6, %v887_v1, %v888_v10  ;;  %v823_v31 = vmax.f32 %v821_v14, %v822_v25  ;;  %983 = vadd.xlane.f32.xlu0 %v982_v33 }
 0x10e   :  { %vm899_vm7 = vcmp.lt.s32.totalorder %v897_v11, %v898_v20  ;;  %v891_v35 = vrot.slane %v890_v23, 2 }
 0x10f   :  { %v900_v18 = vsel %vm899_vm7, %v897_v11, %v898_v20  ;;  %v830_v24 = vmax.f32 %v828_v21, %v829_v17  ;;  %v824_v39 = vrot.slane %v823_v31, 2 }
 0x110   :  { %v901_v29 = vrot.slane %v900_v18, 2  ;;  %vm892_vm8 = vcmp.lt.s32.totalorder %v890_v23, %v891_v35 }
 0x111   :  { %v831_v48 = vrot.slane %v830_v24, 2  ;;  %v825_v53 = vmax.f32 %v823_v31, %v824_v39  ;;  %2748 = vmatpush3.bf16.xpose.msk.msra.mxu0 %vm3477_vm3, %v3140_v34  ;;  %v893_v0 = vsel %vm892_vm8, %v890_v23, %v891_v35 }
 0x112   :  { %vm902_vm9 = vcmp.lt.s32.totalorder %v900_v18, %v901_v29  ;;  %2749 = vmatprep.subr.bf16.mxu0 %v2884_v3  ;;  %v894_v16 = vrot.slane %v893_v0, 1 }
 0x113   :  { %v832_v6 = vmax.f32 %v830_v24, %v831_v48  ;;  %2764 = vmatpush3.bf16.xpose.msk.msra.mxu1 %vm3477_vm3, %v3150_v40  ;;  %v903_v43 = vsel %vm902_vm9, %v900_v18, %v901_v29  ;;  %v826_v44 = vrot.slane %v825_v53, 1 }
 0x114   :  { %2765 = vmatprep.subr.bf16.mxu1 %v2884_v3  ;;  %v904_v45 = vrot.slane %v903_v43, 1  ;;  %vm895_vm10 = vcmp.lt.s32.totalorder %v893_v0, %v894_v16 }
 0x115   :  { %v833_v46 = vrot.slane %v832_v6, 1  ;;  %v827_v51 = vmax.f32 %v825_v53, %v826_v44  ;;  %v896_v52 = vsel %vm895_vm10, %v893_v0, %v894_v16 }
 0x116   :  { %vm905_vm11 = vcmp.lt.s32.totalorder %v903_v43, %v904_v45  ;;  %vm949_vm12 = vcmp.eq.s32.totalorder %v3531_v55, %v896_v52 }
 0x117   :  { %v834_v34 = vmax.f32 %v832_v6, %v833_v46  ;;  %v906_v54 = vsel %vm905_vm11, %v903_v43, %v904_v45  ;;  %vm855_vm13 = vcmp.ge.f32.partialorder %v578_v4, %v827_v51  ;;  %v2087_v40 = vsel %vm949_vm12, 1.0, %v2886_v12 }
 0x118   :  { %vm950_vm14 = vcmp.eq.s32.totalorder %v3531_v55, %v906_v54  ;;  %v863_v57 = vsel %vm855_vm13, %v3531_v55, 8  ;;  %v985_v58 = vsel %vm792_vm2, %v2087_v40, 0.0 }
 0x119   :  { %vm856_vm15 = vcmp.ge.f32.partialorder %v648_v13, %v834_v34  ;;  %v907_v61 = vsel %vm792_vm2, %v863_v57, 2147483647  ;;  %2752 = vmatpush3.bf16.xpose.msk.msra.mxu0 %vm3477_vm3, %v3176_v50  ;;  %986 = vadd.xlane.f32.xlu1 %v985_v58  ;;  %v718_v63 = vpop.f32.mrb[6].mxu0  ;;  %v2088_v1 = vsel %vm950_vm14, 1.0, %v2886_v12 }
 0x11a   :  { %v864_v59 = vsel %vm856_vm15, %v3531_v55, 8  ;;  %v908_v4 = vrot.slane %v907_v61, 4  ;;  %v835_v11 = vsel %vm792_vm2, %v718_v63, -inf  ;;  %v2441_v13 = vpop.f32.mrb[7].mxu0  ;;  %2753 = vmatprep.subr.bf16.mxu0 %v2884_v3  ;;  %v988_v25 = vsel %vm792_vm2, %v2088_v1, 0.0 }
 0x11b   :  { %v917_v7 = vsel %vm792_vm2, %v864_v59, 2147483647  ;;  %2768 = vmatpush3.bf16.xpose.msk.msra.mxu1 %vm3477_vm3, %v3186_v56  ;;  %v788_v10 = vpop.f32.mrb[6].mxu1  ;;  %v836_v15 = vrot.slane %v835_v11, 4 }
 0x11c   :  { %v918_v14 = vrot.slane %v917_v7, 4  ;;  %v842_v50 = vsel %vm792_vm2, %v788_v10, -inf  ;;  %v2460_v20 = vpop.f32.mrb[7].mxu1  ;;  %2769 = vmatprep.subr.bf16.mxu1 %v2884_v3  ;;  %vm909_vm5 = vcmp.lt.s32.totalorder %v907_v61, %v908_v4 }
 0x11d   :  { %v843_v21 = vrot.slane %v842_v50, 4  ;;  %v910_v28 = vsel %vm909_vm5, %v907_v61, %v908_v4  ;;  %v837_v56 = vmax.f32 %v835_v11, %v836_v15  ;;  %989 = vadd.xlane.f32.xlu1 %v988_v25 }
 0x11e   :  { %vm919_vm6 = vcmp.lt.s32.totalorder %v917_v7, %v918_v14  ;;  %v911_v23 = vrot.slane %v910_v28, 2 }
 0x11f   :  { %v920_v17 = vsel %vm919_vm6, %v917_v7, %v918_v14  ;;  %v844_v31 = vmax.f32 %v842_v50, %v843_v21  ;;  %v838_v35 = vrot.slane %v837_v56, 2 }
 0x120   :  { %v921_v33 = vrot.slane %v920_v17, 2  ;;  %vm912_vm7 = vcmp.lt.s32.totalorder %v910_v28, %v911_v23 }
 0x121   :  { %v845_v18 = vrot.slane %v844_v31, 2  ;;  %v839_v24 = vmax.f32 %v837_v56, %v838_v35  ;;  %2756 = vmatpush3.bf16.xpose.msk.msra.mxu0 %vm3477_vm3, %v3208_v2  ;;  %v913_v29 = vsel %vm912_vm7, %v910_v28, %v911_v23 }
 0x122   :  { %vm922_vm8 = vcmp.lt.s32.totalorder %v920_v17, %v921_v33  ;;  %2773 = vmatprep.subr.bf16.mxu0 %v2884_v3  ;;  %v914_v53 = vrot.slane %v913_v29, 1 }
 0x123   :  { %v846_v39 = vmax.f32 %v844_v31, %v845_v18  ;;  %2772 = vmatpush3.bf16.xpose.msk.msra.mxu1 %vm3477_vm3, %v3218_v9  ;;  %v923_v48 = vsel %vm922_vm8, %v920_v17, %v921_v33  ;;  %v840_v0 = vrot.slane %v839_v24, 1  ;;  %v976_v33 = vld [vmem:[#allocation3 + $0x28] sm:$0xff]  ;;  %v975_v18 = vld [vmem:[#allocation3 + $0x20] sm:$0xff] }
 0x124   :  { %2789 = vmatprep.subr.bf16.mxu1 %v2884_v3  ;;  %v924_v6 = vrot.slane %v923_v48, 1  ;;  %vm915_vm9 = vcmp.lt.s32.totalorder %v913_v29, %v914_v53 }
 0x125   :  { %v847_v16 = vrot.slane %v846_v39, 1  ;;  %v841_v43 = vmax.f32 %v839_v24, %v840_v0  ;;  %v916_v2 = vsel %vm915_vm9, %v913_v29, %v914_v53 }
 0x126   :  { %vm925_vm10 = vcmp.lt.s32.totalorder %v923_v48, %v924_v6  ;;  %vm951_vm11 = vcmp.eq.s32.totalorder %v3531_v55, %v916_v2 }
 0x127   :  { %v848_v44 = vmax.f32 %v846_v39, %v847_v16  ;;  %v926_v45 = vsel %vm925_vm10, %v923_v48, %v924_v6  ;;  %vm857_vm12 = vcmp.ge.f32.partialorder %v718_v63, %v841_v43  ;;  %v2089_v9 = vsel %vm951_vm11, 1.0, %v2886_v12 }
 0x128   :  { %vm952_vm13 = vcmp.eq.s32.totalorder %v3531_v55, %v926_v45  ;;  %v865_v46 = vsel %vm857_vm12, %v3531_v55, 8  ;;  %2516 = vmatmul.mubr.msk.f32.vlgmr.msra.gmra.mrb[10].mxu0 %vm792_vm2, %v2087_v40  ;;  %v991_v52 = vsel %vm792_vm2, %v2089_v9, 0.0  ;;  %v977_v45 = vld [vmem:[#allocation3 + $0x30] sm:$0xff]  ;;  %vm1991_vm12 = vcmask 1045509  }
 0x129   :  { %vm858_vm14 = vcmp.ge.f32.partialorder %v788_v10, %v848_v44  ;;  %v2090_v51 = vsel %vm952_vm13, 1.0, %v2886_v12  ;;  %v927_v54 = vsel %vm792_vm2, %v865_v46, 2147483647  ;;  %2776 = vmatpush3.bf16.xpose.msk.msra.mxu0 %vm3477_vm3, %v3240_v22  ;;  %992 = vadd.xlane.f32.xlu0 %v991_v52  ;;  %vm1993_vm13 = vcmask 1046534  }
 0x12a   :  { %v866_v34 = vsel %vm858_vm14, %v3531_v55, 8  ;;  %2535 = vmatmul.mubr.msk.f32.vlgmr.msra.gmra.mrb[10].mxu1 %vm792_vm2, %v2088_v1  ;;  %v994_v57 = vsel %vm792_vm2, %v2090_v51, 0.0  ;;  %v928_v59 = vrot.slane %v927_v54, 4  ;;  %2777 = vmatprep.subr.bf16.mxu0 %v2884_v3  ;;  %v2887_v1 = vmov 0  }
 0x12b   :  { %v937_v58 = vsel %vm792_vm2, %v866_v34, 2147483647  ;;  %2792 = vmatpush3.bf16.xpose.msk.msra.mxu1 %vm3477_vm3, %v3250_v30  ;;  %995 = vadd.xlane.f32.xlu1 %v994_v57  ;;  %vm1995_vm14 = vcmask 1047559  }
 0x12c   :  { %v938_v40 = vrot.slane %v937_v58, 4  ;;  %vm929_vm15 = vcmp.lt.s32.totalorder %v927_v54, %v928_v59  ;;  %2793 = vmatprep.subr.bf16.mxu1 %v2884_v3  ;;  %2553 = vmatprep.mubr.msk.f32.mxu0 %vm2885_vm1, %v2886_v12 }
 0x12d   :  { %v930_v22 = vsel %vm929_vm15, %v927_v54, %v928_v59  ;;  %2572 = vmatprep.mubr.msk.f32.mxu1 %vm2885_vm1, %v2886_v12  ;;  %2842 = vset.pattern.permute.xlu0 %v2887_v1 }
 0x12e   :  { %vm939_vm5 = vcmp.lt.s32.totalorder %v937_v58, %v938_v40  ;;  %v931_v63 = vrot.slane %v930_v22, 2  ;;  %2843 = vset.pattern.permute.xlu1 %v2887_v1 }
 0x12f   :  { %v940_v61 = vsel %vm939_vm5, %v937_v58, %v938_v40 }
 0x130   :  { %v941_v30 = vrot.slane %v940_v61, 2  ;;  %vm932_vm6 = vcmp.lt.s32.totalorder %v930_v22, %v931_v63 }
 0x131   :  { %2780 = vmatpush3.bf16.xpose.msk.msra.mxu0 %vm3477_vm3, %v3276_v42  ;;  %v933_v7 = vsel %vm932_vm6, %v930_v22, %v931_v63 }
 0x132   :  { %vm942_vm7 = vcmp.lt.s32.totalorder %v940_v61, %v941_v30  ;;  %2781 = vmatprep.subr.bf16.mxu0 %v2884_v3  ;;  %v934_v10 = vrot.slane %v933_v7, 1 }
 0x133   :  { %2796 = vmatpush3.bf16.xpose.msk.msra.mxu1 %vm3477_vm3, %v3286_v47  ;;  %v943_v4 = vsel %vm942_vm7, %v940_v61, %v941_v30 }
 0x134   :  { %2797 = vmatprep.subr.bf16.mxu1 %v2884_v3  ;;  %v944_v11 = vrot.slane %v943_v4, 1  ;;  %vm935_vm8 = vcmp.lt.s32.totalorder %v933_v7, %v934_v10 }
 0x135   :  { %v936_v13 = vsel %vm935_vm8, %v933_v7, %v934_v10  ;;  %v1020_v7 = vld [vmem:[#allocation2] sm:$0xff] }
 0x136   :  { %vm945_vm9 = vcmp.lt.s32.totalorder %v943_v4, %v944_v11  ;;  %vm953_vm10 = vcmp.eq.s32.totalorder %v3531_v55, %v936_v13 }
 0x137   :  { %v946_v14 = vsel %vm945_vm9, %v943_v4, %v944_v11  ;;  %v2091_v42 = vsel %vm953_vm10, 1.0, %v2886_v12  ;;  %v1021_v4 = vld [vmem:[#allocation2 + $0x8] sm:$0xff] }
 0x138   :  { %vm954_vm11 = vcmp.eq.s32.totalorder %v3531_v55, %v946_v14  ;;  %v997_v47 = vsel %vm792_vm2, %v2091_v42, 0.0 }
 0x139   :  { %v2092_v50 = vsel %vm954_vm11, 1.0, %v2886_v12  ;;  %2784 = vmatpush3.bf16.xpose.msk.msra.mxu0 %vm3477_vm3, %v3312_v60  ;;  %998 = vadd.xlane.f32.xlu0 %v997_v47 }
 0x13a   :  { %v1000_v15 = vsel %vm792_vm2, %v2092_v50, 0.0  ;;  %2785 = vmatprep.subr.bf16.mxu0 %v2884_v3 }
 0x13b   :  { %2800 = vmatpush3.bf16.xpose.msk.msra.mxu1 %vm3477_vm3, %v3325_v5  ;;  %1001 = vadd.xlane.f32.xlu1 %v1000_v15 }
 0x13c   :  { %2801 = vmatprep.subr.bf16.mxu1 %v2884_v3 }
 0x141   :  { %2788 = vmatpush3.bf16.xpose.msk.msra.mxu0 %vm3477_vm3, %v3344_v19  ;;  %v972_v19 = vld [vmem:[#allocation3 + $0x8] sm:$0xff] }
 0x142   :  { %2805 = vmatprep.subr.bf16.mxu0 %v2884_v3 }
 0x143   :  { %2804 = vmatpush3.bf16.xpose.msk.msra.mxu1 %vm3477_vm3, %v3354_v27 }
 0x144   :  { %2821 = vmatprep.subr.bf16.mxu1 %v2884_v3 }
 0x148   :  { %2554 = vmatmul.mubr.msk.f32.vlgmr.msra.gmra.mrb[12].mxu0 %vm792_vm2, %v2089_v9  ;;  %v978_v9 = vld [vmem:[#allocation3 + $0x38] sm:$0xff] }
 0x149   :  { %2808 = vmatpush3.bf16.xpose.msk.msra.mxu0 %vm3477_vm3, %v3376_v41  ;;  %2591 = vmatprep.mubr.msk.f32.mxu0 %vm2885_vm1, %v2886_v12 }
 0x14a   :  { %2573 = vmatmul.mubr.msk.f32.vlgmr.msra.gmra.mrb[12].mxu1 %vm792_vm2, %v2090_v51  ;;  %2809 = vmatprep.subr.bf16.mxu0 %v2884_v3 }
 0x14b   :  { %2824 = vmatpush3.bf16.xpose.msk.msra.mxu1 %vm3477_vm3, %v3386_v49  ;;  %2610 = vmatprep.mubr.msk.f32.mxu1 %vm2885_vm1, %v2886_v12  ;;  %v971_v12 = vld [vmem:[#allocation3] sm:$0xff]  ;;  %vm1983_vm1 = vcmask 1041409  }
 0x14c   :  { %2825 = vmatprep.subr.bf16.mxu1 %v2884_v3 }
 0x151   :  { %2812 = vmatpush3.bf16.xpose.msk.msra.mxu0 %vm3477_vm3, %v3412_v62  ;;  %v973_v62 = vld [vmem:[#allocation3 + $0x10] sm:$0xff] }
 0x152   :  { %2813 = vmatprep.subr.bf16.mxu0 %v2884_v3 }
 0x153   :  { %2828 = vmatpush3.bf16.xpose.msk.msra.mxu1 %vm3477_vm3, %v3422_v8 }
 0x154   :  { %2829 = vmatprep.subr.bf16.mxu1 %v2884_v3 }
 0x159   :  { %2816 = vmatpush3.bf16.xpose.msk.msra.mxu0 %vm3477_vm3, %v3448_v26 }
 0x15a   :  { %2817 = vmatprep.subr.bf16.mxu0 %v2884_v3 }
 0x15b   :  { %2832 = vmatpush3.bf16.xpose.msk.msra.mxu1 %vm3477_vm3, %v3452_v32 }
 0x15c   :  { %2833 = vmatprep.subr.bf16.mxu1 %v2884_v3 }
 0x161   :  { %2820 = vmatpush3.bf16.xpose.msk.msra.mxu0 %vm3477_vm3, %v3456_v36 }
 0x163   :  { %2836 = vmatpush3.bf16.xpose.msk.msra.mxu1 %vm3477_vm3, %v3460_v37  ;;  %vm1987_vm3 = vcmask 1043459  }
 0x168   :  { %2592 = vmatmul.mubr.msk.f32.vlgmr.msra.gmra.mrb[14].mxu0 %vm792_vm2, %v2091_v42 }
 0x16a   :  { %2611 = vmatmul.mubr.msk.f32.vlgmr.msra.gmra.mrb[14].mxu1 %vm792_vm2, %v2092_v50  ;;  %vm1985_vm2 = vcmask 1042434  }
 0x196   :  { %v981_v60 = vpop.xlane.xlu0 %980 }
 0x197   :  { %v1003_v5 = vadd.f32 %v981_v60, %v971_v12  ;;  %v1022_v12 = vld [vmem:[#allocation2 + $0x10] sm:$0xff]  ;;  %v1023_v60 = vld [vmem:[#allocation2 + $0x18] sm:$0xff] }
 0x199   :  { %1012 = vst.msk [vmem:[#allocation3] sm:$0xff] %vm25_vm4, %v1003_v5 }
 0x19a   :  { %v984_v27 = vpop.xlane.xlu0 %983 }
 0x19b   :  { %v1004_v3 = vadd.f32 %v984_v27, %v972_v19 }
 0x19d   :  { %1013 = vst.msk [vmem:[#allocation3 + $0x8] sm:$0xff] %vm25_vm4, %v1004_v3 }
 0x1a0   :  { %v1823_v41 = vld [vmem:[#allocation3] sm:$0xff] }
 0x1a1   :  { %v1831_v49 = vmax.f32 %v1823_v41, 1.0 }
 0x1a3   :  { %v1839_v8 = vmul.f32 16.0, %v1831_v49 }
 0x1a4   :  { %v1824_v26 = vld [vmem:[#allocation3 + $0x8] sm:$0xff] }
 0x1a5   :  { %2844 = vrcp.f32 %v1839_v8  ;;  %v1832_v36 = vmax.f32 %v1824_v26, 1.0  ;;  %v1025_v8 = vld [vmem:[#allocation2 + $0x28] sm:$0xff] }
 0x1a6   :  { %v987_v32 = vpop.xlane.xlu1 %986 }
 0x1a7   :  { %v1005_v37 = vadd.f32 %v987_v32, %v973_v62  ;;  %v1840_v55 = vmul.f32 16.0, %v1832_v36  ;;  %v1024_v62 = vld [vmem:[#allocation2 + $0x20] sm:$0xff] }
 0x1a9   :  { %1014 = vst.msk [vmem:[#allocation3 + $0x10] sm:$0xff] %vm25_vm4, %v1005_v37  ;;  %2846 = vrcp.f32 %v1840_v55 }
 0x1aa   :  { %v990_v20 = vpop.xlane.xlu1 %989 }
 0x1ab   :  { %v1006_v21 = vadd.f32 %v990_v20, %v974_v38  ;;  %v1026_v20 = vld [vmem:[#allocation2 + $0x30] sm:$0xff] }
 0x1ad   :  { %1015 = vst.msk [vmem:[#allocation3 + $0x18] sm:$0xff] %vm25_vm4, %v1006_v21  ;;  %v1027_v21 = vld [vmem:[#allocation2 + $0x38] sm:$0xff] }
 0x1af   :  { %v2845_v25 = vpop.eup %2844 }
 0x1b0   :  { %v1825_v28 = vld [vmem:[#allocation3 + $0x10] sm:$0xff]  ;;  %1873 = vperm.xlu0 %2842, %v2845_v25  }
 0x1b1   :  { %v1833_v56 = vmax.f32 %v1825_v28, 1.0 }
 0x1b3   :  { %v1841_v17 = vmul.f32 16.0, %v1833_v56  ;;  %v2847_v23 = vpop.eup %2846 }
 0x1b4   :  { %v1826_v31 = vld [vmem:[#allocation3 + $0x18] sm:$0xff]  ;;  %1878 = vperm.xlu1 %2843, %v2847_v23  }
 0x1b5   :  { %2848 = vrcp.f32 %v1841_v17  ;;  %v1834_v35 = vmax.f32 %v1826_v31, 1.0 }
 0x1b6   :  { %v993_v48 = vpop.xlane.xlu0 %992 }
 0x1b7   :  { %v1842_v29 = vmul.f32 16.0, %v1834_v35  ;;  %v1007_v53 = vadd.f32 %v993_v48, %v975_v18 }
 0x1b8   :  { %v996_v24 = vpop.xlane.xlu1 %995 }
 0x1b9   :  { %v1008_v39 = vadd.f32 %v996_v24, %v976_v33  ;;  %2850 = vrcp.f32 %v1842_v29  ;;  %1016 = vst.msk [vmem:[#allocation3 + $0x20] sm:$0xff] %vm25_vm4, %v1007_v53 }
 0x1bb   :  { %1017 = vst.msk [vmem:[#allocation3 + $0x28] sm:$0xff] %vm25_vm4, %v1008_v39 }
 0x1bf   :  { %v2849_v0 = vpop.eup %2848 }
 0x1c0   :  { %1883 = vperm.xlu1 %2843, %v2849_v0   ;;  %v1827_v16 = vld [vmem:[#allocation3 + $0x20] sm:$0xff] }
 0x1c1   :  { %v1835_v2 = vmax.f32 %v1827_v16, 1.0 }
 0x1c2   :  { %v1828_v6 = vld [vmem:[#allocation3 + $0x28] sm:$0xff] }
 0x1c3   :  { %v2851_v43 = vpop.eup %2850  ;;  %v1836_v44 = vmax.f32 %v1828_v6, 1.0  ;;  %v1843_v46 = vmul.f32 16.0, %v1835_v2 }
 0x1c4   :  { %1888 = vperm.xlu1 %2843, %v2851_v43  }
 0x1c5   :  { %2852 = vrcp.f32 %v1843_v46  ;;  %v1844_v54 = vmul.f32 16.0, %v1836_v44 }
 0x1c6   :  { %v999_v51 = vpop.xlane.xlu0 %998 }
 0x1c7   :  { %v1009_v34 = vadd.f32 %v999_v51, %v977_v45  ;;  %2854 = vrcp.f32 %v1844_v54 }
 0x1c8   :  { %v1002_v52 = vpop.xlane.xlu1 %1001 }
 0x1c9   :  { %v1010_v57 = vadd.f32 %v1002_v52, %v978_v9  ;;  %1018 = vst.msk [vmem:[#allocation3 + $0x30] sm:$0xff] %vm25_vm4, %v1009_v34 }
 0x1cb   :  { %1019 = vst.msk [vmem:[#allocation3 + $0x38] sm:$0xff] %vm25_vm4, %v1010_v57  ;;  %vm1989_vm4 = vcmask 1044484  }
 0x1cf   :  { %v2853_v59 = vpop.eup %2852 }
 0x1d0   :  { %v1829_v58 = vld [vmem:[#allocation3 + $0x30] sm:$0xff]  ;;  %1893 = vperm.xlu1 %2843, %v2853_v59  }
 0x1d1   :  { %v1837_v40 = vmax.f32 %v1829_v58, 1.0  ;;  %v2855_v1 = vpop.eup %2854 }
 0x1d2   :  { %v1830_v22 = vld [vmem:[#allocation3 + $0x38] sm:$0xff] }
 0x1d3   :  { %v1838_v61 = vmax.f32 %v1830_v22, 1.0  ;;  %v1845_v63 = vmul.f32 16.0, %v1837_v40 }
 0x1d4   :  { %1898 = vperm.xlu1 %2843, %v2855_v1  }
 0x1d5   :  { %2856 = vrcp.f32 %v1845_v63  ;;  %v1846_v30 = vmul.f32 16.0, %v1838_v61 }
 0x1d7   :  { %2858 = vrcp.f32 %v1846_v30 }
 0x1db   :  { %v1121_v10 = vpop.f32.mrb[8].mxu0 }
 0x1dc   :  { %v1804_v11 = vadd.f32 %v1121_v10, %v1020_v7  ;;  %v2479_v14 = vpop.f32.mrb[9].mxu0 }
 0x1dd   :  { %v1218_v13 = vpop.f32.mrb[8].mxu1 }
 0x1de   :  { %v1805_v42 = vadd.f32 %v1218_v13, %v1021_v4  ;;  %v2498_v50 = vpop.f32.mrb[9].mxu1  ;;  %1812 = vst.msk [vmem:[#allocation2] sm:$0xff] %vm16_vm0, %v1804_v11 }
 0x1df   :  { %v2857_v47 = vpop.eup %2856 }
 0x1e0   :  { %1813 = vst.msk [vmem:[#allocation2 + $0x8] sm:$0xff] %vm16_vm0, %v1805_v42  ;;  %1903 = vperm.xlu1 %2843, %v2857_v47  }
 0x1e1   :  { %v2859_v15 = vpop.eup %2858 }
 0x1e4   :  { %1908 = vperm.xlu1 %2843, %v2859_v15  }
 0x1e5   :  { %v1863_v53 = vld [vmem:[#allocation2] sm:$0xff] }
 0x1e7   :  { %v1864_v24 = vld [vmem:[#allocation2 + $0x8] sm:$0xff] }
 0x1fb   :  { %v1315_v5 = vpop.f32.mrb[10].mxu0 }
 0x1fc   :  { %v1806_v19 = vadd.f32 %v1315_v5, %v1022_v12  ;;  %v2517_v3 = vpop.f32.mrb[11].mxu0 }
 0x1fd   :  { %v1412_v27 = vpop.f32.mrb[10].mxu1 }
 0x1fe   :  { %v1807_v41 = vadd.f32 %v1412_v27, %v1023_v60  ;;  %v2536_v49 = vpop.f32.mrb[11].mxu1  ;;  %1814 = vst.msk [vmem:[#allocation2 + $0x10] sm:$0xff] %vm16_vm0, %v1806_v19 }
 0x200   :  { %1815 = vst.msk [vmem:[#allocation2 + $0x18] sm:$0xff] %vm16_vm0, %v1807_v41 }
 0x205   :  { %v1865_v48 = vld [vmem:[#allocation2 + $0x10] sm:$0xff] }
 0x207   :  { %v1866_v6 = vld [vmem:[#allocation2 + $0x18] sm:$0xff] }
 0x21b   :  { %v1509_v26 = vpop.f32.mrb[12].mxu0 }
 0x21c   :  { %v1808_v32 = vadd.f32 %v1509_v26, %v1024_v62  ;;  %v2555_v37 = vpop.f32.mrb[13].mxu0 }
 0x21d   :  { %v1606_v36 = vpop.f32.mrb[12].mxu1 }
 0x21e   :  { %v1809_v38 = vadd.f32 %v1606_v36, %v1025_v8  ;;  %v2574_v55 = vpop.f32.mrb[13].mxu1  ;;  %1816 = vst.msk [vmem:[#allocation2 + $0x20] sm:$0xff] %vm16_vm0, %v1808_v32 }
 0x220   :  { %1817 = vst.msk [vmem:[#allocation2 + $0x28] sm:$0xff] %vm16_vm0, %v1809_v38 }
 0x225   :  { %v1867_v44 = vld [vmem:[#allocation2 + $0x20] sm:$0xff] }
 0x227   :  { %v1868_v58 = vld [vmem:[#allocation2 + $0x28] sm:$0xff] }
 0x22f   :  { %v1874_v18 = vpop.permute.xlu0 %1873 }
 0x230   :  { %v1911_v16 = vmul.f32 %v1874_v18, %v1863_v53 }
 0x232   :  { %v1919_v51 = vsel %vm16_vm0, %v1911_v16, 0.0 }
 0x233   :  { %v1879_v33 = vpop.permute.xlu1 %1878  ;;  %v1920_v22 = vrot.slane %v1919_v51, 4 }
 0x234   :  { %v1912_v39 = vmul.f32 %v1879_v33, %v1864_v24 }
 0x235   :  { %v1921_v10 = vadd.f32 %v1920_v22, %v1919_v51 }
 0x236   :  { %v1926_v45 = vsel %vm16_vm0, %v1912_v39, 0.0 }
 0x237   :  { %v1927_v34 = vrot.slane %v1926_v45, 4  ;;  %v1922_v47 = vrot.slane %v1921_v10, 2 }
 0x239   :  { %v1928_v30 = vadd.f32 %v1927_v34, %v1926_v45  ;;  %v1923_v62 = vadd.f32 %v1922_v47, %v1921_v10 }
 0x23b   :  { %v1703_v25 = vpop.f32.mrb[14].mxu0  ;;  %v1929_v14 = vrot.slane %v1928_v30, 2 }
 0x23c   :  { %v1810_v28 = vadd.f32 %v1703_v25, %v1026_v20  ;;  %v2593_v17 = vpop.f32.mrb[15].mxu0 }
 0x23d   :  { %v1800_v56 = vpop.f32.mrb[14].mxu1  ;;  %v1930_v27 = vadd.f32 %v1929_v14, %v1928_v30 }
 0x23e   :  { %v1811_v23 = vadd.f32 %v1800_v56, %v1027_v21  ;;  %v2612_v31 = vpop.f32.mrb[15].mxu1  ;;  %1818 = vst.msk [vmem:[#allocation2 + $0x30] sm:$0xff] %vm16_vm0, %v1810_v28  ;;  %v1924_v56 = vrot.slane %v1923_v62, 1 }
 0x23f   :  { %v1884_v35 = vpop.permute.xlu1 %1883  ;;  %v1931_v55 = vrot.slane %v1930_v27, 1 }
 0x240   :  { %1819 = vst.msk [vmem:[#allocation2 + $0x38] sm:$0xff] %vm16_vm0, %v1811_v23  ;;  %v1913_v0 = vmul.f32 %v1884_v35, %v1865_v48  ;;  %v1925_v48 = vadd.f32 %v1924_v56, %v1923_v62 }
 0x241   :  { %v1932_v35 = vadd.f32 %v1931_v55, %v1930_v27 }
 0x242   :  { %v1933_v46 = vsel %vm16_vm0, %v1913_v0, 0.0 }
 0x243   :  { %v1889_v29 = vpop.permute.xlu1 %1888  ;;  %v1934_v59 = vrot.slane %v1933_v46, 4 }
 0x244   :  { %v1914_v43 = vmul.f32 %v1889_v29, %v1866_v6 }
 0x245   :  { %v1935_v4 = vadd.f32 %v1934_v59, %v1933_v46  ;;  %v1869_v60 = vld [vmem:[#allocation2 + $0x30] sm:$0xff] }
 0x246   :  { %v1940_v52 = vsel %vm16_vm0, %v1914_v43, 0.0  ;;  %v1984_v43 = vsel %vm1983_vm1, %v1932_v35, %v1925_v48 }
 0x247   :  { %v1941_v61 = vrot.slane %v1940_v52, 4  ;;  %v1936_v50 = vrot.slane %v1935_v4, 2  ;;  %v1870_v36 = vld [vmem:[#allocation2 + $0x38] sm:$0xff] }
 0x249   :  { %v1942_v11 = vadd.f32 %v1941_v61, %v1940_v52  ;;  %v1937_v41 = vadd.f32 %v1936_v50, %v1935_v4 }
 0x24b   :  { %v1943_v15 = vrot.slane %v1942_v11, 2  ;;  %v1938_v25 = vrot.slane %v1937_v41, 1 }
 0x24d   :  { %v1944_v8 = vadd.f32 %v1943_v15, %v1942_v11  ;;  %v1939_v39 = vadd.f32 %v1938_v25, %v1937_v41 }
 0x24f   :  { %v1894_v2 = vpop.permute.xlu1 %1893  ;;  %v1945_v17 = vrot.slane %v1944_v8, 1  ;;  %v1986_v45 = vsel %vm1985_vm2, %v1939_v39, %v1984_v43 }
 0x250   :  { %v1915_v9 = vmul.f32 %v1894_v2, %v1867_v44 }
 0x251   :  { %v1946_v53 = vadd.f32 %v1945_v17, %v1944_v8 }
 0x252   :  { %v1947_v54 = vsel %vm16_vm0, %v1915_v9, 0.0 }
 0x253   :  { %v1899_v57 = vpop.permute.xlu1 %1898  ;;  %v1948_v63 = vrot.slane %v1947_v54, 4  ;;  %v1988_v51 = vsel %vm1987_vm3, %v1946_v53, %v1986_v45 }
 0x254   :  { %v1916_v40 = vmul.f32 %v1899_v57, %v1868_v58 }
 0x255   :  { %v1949_v13 = vadd.f32 %v1948_v63, %v1947_v54 }
 0x256   :  { %v1954_v1 = vsel %vm16_vm0, %v1916_v40, 0.0 }
 0x257   :  { %v1955_v7 = vrot.slane %v1954_v1, 4  ;;  %v1950_v5 = vrot.slane %v1949_v13, 2 }
 0x259   :  { %v1956_v42 = vadd.f32 %v1955_v7, %v1954_v1  ;;  %v1951_v37 = vadd.f32 %v1950_v5, %v1949_v13 }
 0x25b   :  { %v1957_v3 = vrot.slane %v1956_v42, 2  ;;  %v1952_v33 = vrot.slane %v1951_v37, 1 }
 0x25d   :  { %v1958_v20 = vadd.f32 %v1957_v3, %v1956_v42  ;;  %v1953_v16 = vadd.f32 %v1952_v33, %v1951_v37 }
 0x25f   :  { %v1904_v12 = vpop.permute.xlu1 %1903  ;;  %v1959_v18 = vrot.slane %v1958_v20, 1  ;;  %v1990_v52 = vsel %vm1989_vm4, %v1953_v16, %v1988_v51 }
 0x260   :  { %v1917_v19 = vmul.f32 %v1904_v12, %v1869_v60 }
 0x261   :  { %v1960_v2 = vadd.f32 %v1959_v18, %v1958_v20 }
 0x262   :  { %v1961_v49 = vsel %vm16_vm0, %v1917_v19, 0.0 }
 0x263   :  { %v1962_v26 = vrot.slane %v1961_v49, 4  ;;  %v1909_v32 = vpop.permute.xlu1 %1908  ;;  %v1992_v54 = vsel %vm1991_vm12, %v1960_v2, %v1990_v52 }
 0x264   :  { %v1918_v38 = vmul.f32 %v1909_v32, %v1870_v36 }
 0x265   :  { %v1963_v21 = vadd.f32 %v1962_v26, %v1961_v49 }
 0x266   :  { %v1968_v28 = vsel %vm16_vm0, %v1918_v38, 0.0 }
 0x267   :  { %v1964_v23 = vrot.slane %v1963_v21, 2  ;;  %v1969_v31 = vrot.slane %v1968_v28, 4 }
 0x269   :  { %v1965_v24 = vadd.f32 %v1964_v23, %v1963_v21  ;;  %v1970_v29 = vadd.f32 %v1969_v31, %v1968_v28 }
 0x26b   :  { %v1966_v0 = vrot.slane %v1965_v24, 1  ;;  %v1971_v6 = vrot.slane %v1970_v29, 2 }
 0x26d   :  { %v1972_v44 = vadd.f32 %v1971_v6, %v1970_v29  ;;  %v1967_v9 = vadd.f32 %v1966_v0, %v1965_v24 }
 0x26f   :  { %v1973_v46 = vrot.slane %v1972_v44, 1  ;;  %v1994_v57 = vsel %vm1993_vm13, %v1967_v9, %v1992_v54 }
 0x271   :  { %v1974_v34 = vadd.f32 %v1973_v46, %v1972_v44 }
 0x273   :  { %v1996_v58 = vsel %vm1995_vm14, %v1974_v34, %v1994_v57 }
 0x274   :  { %1998 = vst.msk [vmem:[#allocation4] sm:$0xff] %vm16_vm0, %v1996_v58 }
 0x275   :  { %2871 = shalt.err (!%p2868_p4)
}
 0x276   :  { %s2872_s13 = scalar_lea.hbm %s3732_s2, 128 }
 0x277   :  { %p2873_p5 = scmp.ne.s32.totalorder %s3732_s2, %s2872_s13  ;;  %p2876_p6 = scmp.lt.u32.totalorder %s2872_s13, %s3732_s2 }
 0x279   :  { %p2878_p7 = pnand %p2876_p6, %p2873_p5 }
 0x27b   :  { %2881 = shalt.err (!%p2878_p7)
}
 0x27c   :  { %2008 = dma.vmem_to_hbm [thread:$0]  %s2006_s9, 128, %s3732_s2, [#allocation5]  }
 0x27d   :  { %2882 = dma.done.wait [#allocation5], 128  }
 0x27e   :  { %2883 = vsyncadd [#allocation5], 4294967168 }
 0x27f   :  { %2012 = vsyncpa [#allocation5], 1 }

</bundles_post_ra>
